<compile_context>
chip_gen: v5e
topology: v5e:2x2
jax: 0.10.0
libtpu: 0.0.40
codegen_flags: <defaults>
</compile_context>

<pallas_src>
from functools import partial

import jax
import jax.numpy as jnp
from jax.experimental import pallas as pl
from jax.experimental.pallas import tpu as pltpu

EPS = 1e-5


def _hardswish(z):
    # x * relu6(x + 3) / 6  == x * min(max(x+3, 0), 6) / 6
    return z * jnp.minimum(jnp.maximum(z + 3.0, 0.0), 6.0) * (1.0 / 6.0)


def _shift_flat(z, s):
    """out[:, i] = z[:, i + s] for 0 <= i+s < L, else 0. `s` is a static int."""
    c, l = z.shape
    if s == 0:
        return z
    zeros = jnp.zeros((c, abs(s)), z.dtype)
    if s > 0:
        return jnp.concatenate([z[:, s:], zeros], axis=1)
    return jnp.concatenate([zeros, z[:, :s]], axis=1)


# ----------------------------------------------------------------------------
# Pass A: 1x1 conv (channel matmul) + streamed per-image partial BN stats.
# ----------------------------------------------------------------------------
def conv1x1_stats_kernel(x_ref, w1_ref, y1_ref, sum_ref, sq_ref):
    # x_ref: (1, C, hw_t)  w1_ref: (C, C)  y1_ref: (1, C, hw_t)
    # sum_ref/sq_ref: (1, C, 1) accumulators, revisited across the hw-tile axis.
    t = pl.program_id(1)
    x = x_ref[0].astype(jnp.float32)                       # (C, hw_t)
    y = jnp.dot(w1_ref[...].astype(jnp.float32), x,
                preferred_element_type=jnp.float32)        # (C_out, hw_t)
    y1_ref[0] = y.astype(y1_ref.dtype)

    @pl.when(t == 0)
    def _():
        sum_ref[...] = jnp.zeros_like(sum_ref)
        sq_ref[...] = jnp.zeros_like(sq_ref)

    sum_ref[0] += jnp.sum(y, axis=1, keepdims=True)
    sq_ref[0] += jnp.sum(y * y, axis=1, keepdims=True)


# ----------------------------------------------------------------------------
# Pass B: BN1(folded)+Hardswish, 3x3 conv via 9 shifted matmuls, partial stats.
# ----------------------------------------------------------------------------
def conv3x3_stats_kernel(y1_ref, s1_ref, b1_ref, w2_ref, wpos_ref,
                         y2_ref, sum_ref, sq_ref, *, H, W):
    # y1_ref: (1, C, HW)  s1/b1: (C, 1)  w2_ref: (3, 3, C_out, C_in)
    # wpos_ref: (1, HW) int32 (w coordinate of each flat position)
    HW = H * W
    y1 = y1_ref[0].astype(jnp.float32)                     # (C, HW)
    z = y1 * s1_ref[...] + b1_ref[...]                     # folded BN affine
    z = _hardswish(z)
    C = z.shape[0]

    wpos = wpos_ref[...]                                   # (1, HW) int32

    acc = jnp.zeros((C, HW), jnp.float32)
    for kh in range(3):
        for kw in range(3):
            oy = kh - 1
            ox = kw - 1
            s = oy * W + ox                                # static flat shift
            patch = _shift_flat(z, s)                      # zero-filled at flat edges
            if ox != 0:                                    # mask row (w) boundary wrap
                valid = (wpos + ox >= 0) & (wpos + ox < W)
                patch = jnp.where(valid, patch, 0.0)
            acc = acc + jnp.dot(w2_ref[kh, kw].astype(jnp.float32), patch,
                                preferred_element_type=jnp.float32)

    y2_ref[0] = acc.astype(y2_ref.dtype)
    sum_ref[0] = jnp.sum(acc, axis=1, keepdims=True)
    sq_ref[0] = jnp.sum(acc * acc, axis=1, keepdims=True)


# ----------------------------------------------------------------------------
# Pass C: BN2(folded) + Hardswish + residual add.
# ----------------------------------------------------------------------------
def bn_act_residual_kernel(y2_ref, x_ref, s2_ref, b2_ref, o_ref):
    y = y2_ref[0].astype(jnp.float32) * s2_ref[...] + b2_ref[...]
    y = _hardswish(y)
    o_ref[0] = (y + x_ref[0].astype(jnp.float32)).astype(o_ref.dtype)


# ----------------------------------------------------------------------------
# Wrapper
# ----------------------------------------------------------------------------
def _fold_bn(sum_n, sq_n, count, gamma, beta):
    tot = jnp.sum(sum_n[:, :, 0], axis=0)
    totsq = jnp.sum(sq_n[:, :, 0], axis=0)
    mean = tot / count
    var = jnp.maximum(totsq / count - mean * mean, 0.0)
    inv = jax.lax.rsqrt(var + EPS)
    scale = gamma * inv
    shift = beta - mean * scale
    C = scale.shape[0]
    return (scale.reshape(C, 1).astype(jnp.float32),
            shift.reshape(C, 1).astype(jnp.float32))


@partial(jax.jit, static_argnames=("hw_tile",))
def bottleneck_forward(x, w1, g1, be1, w2, g2, be2, *, hw_tile=None):
    """x: (N, C, H, W); w1: (C, C, 1, 1); w2: (C, C, 3, 3); g*/be*: (C,)."""
    N, C, H, W = x.shape
    HW = H * W
    f32 = jnp.float32

    if hw_tile is None:
        hw_tile = HW
        for cand in (2048, 1024, 512, 256, 128):
            if HW % cand == 0:
                hw_tile = cand
                break
    assert HW % hw_tile == 0
    T = HW // hw_tile

    x3 = x.reshape(N, C, HW)                          # free view, no transpose
    w1m = w1.reshape(C, C).astype(f32)                # (C_out, C_in)
    w2k = jnp.transpose(w2, (2, 3, 0, 1)).astype(f32)  # (3, 3, C_out, C_in) (tiny)
    wpos = jnp.tile(jnp.arange(W, dtype=jnp.int32), H).reshape(1, HW)

    # ---------------- pass A: conv1x1 + stats ----------------
    y1, s1sum, s1sq = pl.pallas_call(
        conv1x1_stats_kernel,
        grid=(N, T),
        in_specs=[
            pl.BlockSpec((1, C, hw_tile), lambda n, t: (n, 0, t)),
            pl.BlockSpec((C, C), lambda n, t: (0, 0)),
        ],
        out_specs=[
            pl.BlockSpec((1, C, hw_tile), lambda n, t: (n, 0, t)),
            pl.BlockSpec((1, C, 1), lambda n, t: (n, 0, 0)),
            pl.BlockSpec((1, C, 1), lambda n, t: (n, 0, 0)),
        ],
        out_shape=[
            jax.ShapeDtypeStruct((N, C, HW), f32),
            jax.ShapeDtypeStruct((N, C, 1), f32),
            jax.ShapeDtypeStruct((N, C, 1), f32),
        ],
        compiler_params=pltpu.CompilerParams(
            dimension_semantics=("parallel", "arbitrary")),
    )(x3, w1m)

    scale1, shift1 = _fold_bn(s1sum, s1sq, float(N * HW), g1.astype(f32), be1.astype(f32))

    # ---------------- pass B: BN1+hswish -> conv3x3 + stats ----------------
    y2, s2sum, s2sq = pl.pallas_call(
        partial(conv3x3_stats_kernel, H=H, W=W),
        grid=(N,),
        in_specs=[
            pl.BlockSpec((1, C, HW), lambda n: (n, 0, 0)),
            pl.BlockSpec((C, 1), lambda n: (0, 0)),
            pl.BlockSpec((C, 1), lambda n: (0, 0)),
            pl.BlockSpec((3, 3, C, C), lambda n: (0, 0, 0, 0)),
            pl.BlockSpec((1, HW), lambda n: (0, 0)),
        ],
        out_specs=[
            pl.BlockSpec((1, C, HW), lambda n: (n, 0, 0)),
            pl.BlockSpec((1, C, 1), lambda n: (n, 0, 0)),
            pl.BlockSpec((1, C, 1), lambda n: (n, 0, 0)),
        ],
        out_shape=[
            jax.ShapeDtypeStruct((N, C, HW), f32),
            jax.ShapeDtypeStruct((N, C, 1), f32),
            jax.ShapeDtypeStruct((N, C, 1), f32),
        ],
        compiler_params=pltpu.CompilerParams(dimension_semantics=("parallel",)),
    )(y1, scale1, shift1, w2k, wpos)

    scale2, shift2 = _fold_bn(s2sum, s2sq, float(N * HW), g2.astype(f32), be2.astype(f32))

    # ---------------- pass C: BN2+hswish + residual ----------------
    out3 = pl.pallas_call(
        bn_act_residual_kernel,
        grid=(N, T),
        in_specs=[
            pl.BlockSpec((1, C, hw_tile), lambda n, t: (n, 0, t)),
            pl.BlockSpec((1, C, hw_tile), lambda n, t: (n, 0, t)),
            pl.BlockSpec((C, 1), lambda n, t: (0, 0)),
            pl.BlockSpec((C, 1), lambda n, t: (0, 0)),
        ],
        out_specs=pl.BlockSpec((1, C, hw_tile), lambda n, t: (n, 0, t)),
        out_shape=jax.ShapeDtypeStruct((N, C, HW), x.dtype),
        compiler_params=pltpu.CompilerParams(
            dimension_semantics=("parallel", "parallel")),
    )(y2, x3, scale2, shift2)

    return out3.reshape(N, C, H, W)


# ----------------------------------------------------------------------------
# Pure-JAX reference (PyTorch training-mode semantics)
# ----------------------------------------------------------------------------
def reference(x, w1, g1, be1, w2, g2, be2):
    def bn_hswish(y, g, b):
        m = jnp.mean(y, axis=(0, 2, 3), keepdims=True)
        v = jnp.mean((y - m) ** 2, axis=(0, 2, 3), keepdims=True)
        z = (y - m) * jax.lax.rsqrt(v + EPS)
        z = z * g.reshape(1, -1, 1, 1) + b.reshape(1, -1, 1, 1)
        return z * jnp.clip(z + 3.0, 0.0, 6.0) / 6.0

    dn = ("NCHW", "OIHW", "NCHW")
    y1 = jax.lax.conv_general_dilated(x, w1, (1, 1), "VALID", dimension_numbers=dn)
    z1 = bn_hswish(y1, g1, be1)
    y2 = jax.lax.conv_general_dilated(z1, w2, (1, 1), ((1, 1), (1, 1)),
                                      dimension_numbers=dn)
    z2 = bn_hswish(y2, g2, be2)
    return z2 + x


if __name__ == "__main__":
    key = jax.random.PRNGKey(0)
    ks = jax.random.split(key, 7)

    N, C, H, W = 2, 4, 16, 16
    x = jax.random.normal(ks[0], (N, C, H, W), dtype=jnp.float32)
    w1 = jax.random.normal(ks[1], (C, C, 1, 1), dtype=jnp.float32) * (2.0 / C) ** 0.5
    w2 = jax.random.normal(ks[2], (C, C, 3, 3), dtype=jnp.float32) * (2.0 / (C * 9)) ** 0.5
    g1 = 1.0 + 0.1 * jax.random.normal(ks[3], (C,), dtype=jnp.float32)
    b1 = 0.1 * jax.random.normal(ks[4], (C,), dtype=jnp.float32)
    g2 = 1.0 + 0.1 * jax.random.normal(ks[5], (C,), dtype=jnp.float32)
    b2 = 0.1 * jax.random.normal(ks[6], (C,), dtype=jnp.float32)

    # hw_tile=128 exercises the multi-tile streamed-stats path at this toy size.
    out = bottleneck_forward(x, w1, g1, b1, w2, g2, b2, hw_tile=128)
    jax.block_until_ready(out)

    ref = reference(x, w1, b1 * 0 + g1, b1, w2, g2, b2)  # same params, explicit
    ref = reference(x, w1, g1, b1, w2, g2, b2)
    assert out.shape == ref.shape
    assert jnp.allclose(out, ref, atol=1e-2, rtol=1e-2), (
        "mismatch vs reference, max abs err = "
        f"{float(jnp.max(jnp.abs(out - ref)))}")

    print("KERNEL_OK")
</pallas_src>

<mosaic_0001>
module attributes {stable_mosaic.version = 11 : i64} {
  func.func @conv1x1_stats_kernel(%arg0: i32, %arg1: i32, %arg2: memref<1x4x128xf32, #tpu.memory_space<vmem>>, %arg3: memref<4x4xf32, #tpu.memory_space<vmem>>, %arg4: memref<1x4x128xf32, #tpu.memory_space<vmem>>, %arg5: memref<1x4x1xf32, #tpu.memory_space<vmem>>, %arg6: memref<1x4x1xf32, #tpu.memory_space<vmem>>) attributes {dimension_semantics = [#tpu.dimension_semantics<parallel>, #tpu.dimension_semantics<arbitrary>], iteration_bounds = array<i64: 2, 2>, scalar_prefetch = 0 : i64, scratch_operands = 0 : i64, tpu.core_type = #tpu.core_type<tc>, window_params = [{transform_indices = @transform_0, window_bounds = array<i64: 1, 4, 128>}, {pipeline_mode = #tpu.pipeline_mode<synchronous>, transform_indices = @transform_1, window_bounds = array<i64: 4, 4>}, {transform_indices = @transform_2, window_bounds = array<i64: 1, 4, 128>}, {transform_indices = @transform_3, window_bounds = array<i64: 1, 4, 1>}, {transform_indices = @transform_4, window_bounds = array<i64: 1, 4, 1>}]} {
    %c0 = arith.constant 0 : index
    %c0_0 = arith.constant 0 : index
    %c0_1 = arith.constant 0 : index
    %0 = vector.load %arg2[%c0, %c0_0, %c0_1] : memref<1x4x128xf32, #tpu.memory_space<vmem>>, vector<1x4x128xf32>
    %1 = vector.shape_cast %0 : vector<1x4x128xf32> to vector<4x128xf32>
    %c0_2 = arith.constant 0 : index
    %c0_3 = arith.constant 0 : index
    %2 = vector.load %arg3[%c0_2, %c0_3] : memref<4x4xf32, #tpu.memory_space<vmem>>, vector<4x4xf32>
    %cst = arith.constant dense<0.000000e+00> : vector<4x128xf32>
    %3 = tpu.matmul %2, %1, %cst {dimension_numbers = #tpu.dot_dimension_numbers<[1], [0], [0], [1], [0, 0, 1, 1], [], []>} : vector<4x4xf32>, vector<4x128xf32>, vector<4x128xf32> -> vector<4x128xf32>
    %c0_4 = arith.constant 0 : index
    %c0_5 = arith.constant 0 : index
    %c0_6 = arith.constant 0 : index
    %4 = vector.load %arg4[%c0_4, %c0_5, %c0_6] : memref<1x4x128xf32, #tpu.memory_space<vmem>>, vector<1x4x128xf32>
    %5 = vector.shape_cast %4 : vector<1x4x128xf32> to vector<4x128xf32>
    %6 = vector.shape_cast %3 : vector<4x128xf32> to vector<1x4x128xf32>
    tpu.vector_store %arg4[%c0_4, %c0_5, %c0_6], %6 {strides = array<i32>} : memref<1x4x128xf32, #tpu.memory_space<vmem>>, vector<1x4x128xf32>,
    %c0_i32 = arith.constant 0 : i32
    %7 = arith.cmpi eq, %arg1, %c0_i32 : i32
    %8 = arith.extui %7 : i1 to i32
    %c0_i32_7 = arith.constant 0 : i32
    %9 = arith.cmpi ne, %8, %c0_i32_7 : i32
    scf.if %9 {
      %cst_22 = arith.constant 0.000000e+00 : f32
      %27 = vector.broadcast %cst_22 : f32 to vector<1x4x1xf32>
      %c0_23 = arith.constant 0 : index
      %c0_24 = arith.constant 0 : index
      %c0_25 = arith.constant 0 : index
      %28 = vector.load %arg5[%c0_23, %c0_24, %c0_25] : memref<1x4x1xf32, #tpu.memory_space<vmem>>, vector<1x4x1xf32>
      tpu.vector_store %arg5[%c0_23, %c0_24, %c0_25], %27 {strides = array<i32>} : memref<1x4x1xf32, #tpu.memory_space<vmem>>, vector<1x4x1xf32>,
      %cst_26 = arith.constant 0.000000e+00 : f32
      %29 = vector.broadcast %cst_26 : f32 to vector<1x4x1xf32>
      %c0_27 = arith.constant 0 : index
      %c0_28 = arith.constant 0 : index
      %c0_29 = arith.constant 0 : index
      %30 = vector.load %arg6[%c0_27, %c0_28, %c0_29] : memref<1x4x1xf32, #tpu.memory_space<vmem>>, vector<1x4x1xf32>
      tpu.vector_store %arg6[%c0_27, %c0_28, %c0_29], %29 {strides = array<i32>} : memref<1x4x1xf32, #tpu.memory_space<vmem>>, vector<1x4x1xf32>,
    } else {
    }
    %c0_8 = arith.constant 0 : index
    %c0_9 = arith.constant 0 : index
    %c0_10 = arith.constant 0 : index
    %10 = vector.load %arg5[%c0_8, %c0_9, %c0_10] : memref<1x4x1xf32, #tpu.memory_space<vmem>>, vector<1x4x1xf32>
    %11 = vector.shape_cast %10 : vector<1x4x1xf32> to vector<4x1xf32>
    %cst_11 = arith.constant dense<0.000000e+00> : vector<4xf32>
    %12 = vector.multi_reduction <add>, %3, %cst_11 [1] : vector<4x128xf32> to vector<4xf32>
    %13 = vector.shape_cast %12 : vector<4xf32> to vector<4x1xf32>
    %14 = arith.addf %11, %13 : vector<4x1xf32>
    %c0_12 = arith.constant 0 : index
    %c0_13 = arith.constant 0 : index
    %c0_14 = arith.constant 0 : index
    %15 = vector.load %arg5[%c0_12, %c0_13, %c0_14] : memref<1x4x1xf32, #tpu.memory_space<vmem>>, vector<1x4x1xf32>
    %16 = vector.shape_cast %15 : vector<1x4x1xf32> to vector<4x1xf32>
    %17 = vector.shape_cast %14 : vector<4x1xf32> to vector<1x4x1xf32>
    tpu.vector_store %arg5[%c0_12, %c0_13, %c0_14], %17 {strides = array<i32>} : memref<1x4x1xf32, #tpu.memory_space<vmem>>, vector<1x4x1xf32>,
    %c0_15 = arith.constant 0 : index
    %c0_16 = arith.constant 0 : index
    %c0_17 = arith.constant 0 : index
    %18 = vector.load %arg6[%c0_15, %c0_16, %c0_17] : memref<1x4x1xf32, #tpu.memory_space<vmem>>, vector<1x4x1xf32>
    %19 = vector.shape_cast %18 : vector<1x4x1xf32> to vector<4x1xf32>
    %20 = arith.mulf %3, %3 : vector<4x128xf32>
    %cst_18 = arith.constant dense<0.000000e+00> : vector<4xf32>
    %21 = vector.multi_reduction <add>, %20, %cst_18 [1] : vector<4x128xf32> to vector<4xf32>
    %22 = vector.shape_cast %21 : vector<4xf32> to vector<4x1xf32>
    %23 = arith.addf %19, %22 : vector<4x1xf32>
    %c0_19 = arith.constant 0 : index
    %c0_20 = arith.constant 0 : index
    %c0_21 = arith.constant 0 : index
    %24 = vector.load %arg6[%c0_19, %c0_20, %c0_21] : memref<1x4x1xf32, #tpu.memory_space<vmem>>, vector<1x4x1xf32>
    %25 = vector.shape_cast %24 : vector<1x4x1xf32> to vector<4x1xf32>
    %26 = vector.shape_cast %23 : vector<4x1xf32> to vector<1x4x1xf32>
    tpu.vector_store %arg6[%c0_19, %c0_20, %c0_21], %26 {strides = array<i32>} : memref<1x4x1xf32, #tpu.memory_space<vmem>>, vector<1x4x1xf32>,
    return
  }
  func.func @transform_0(%arg0: i32, %arg1: i32) -> (i32, i32, i32) {
    %c0_i32 = arith.constant 0 : i32
    %c0_i32_0 = arith.constant 0 : i32
    return %arg0, %c0_i32, %arg1 : i32, i32, i32
  }
  func.func @transform_1(%arg0: i32, %arg1: i32) -> (i32, i32) {
    %c0_i32 = arith.constant 0 : i32
    %c0_i32_0 = arith.constant 0 : i32
    %c0_i32_1 = arith.constant 0 : i32
    return %c0_i32, %c0_i32_0 : i32, i32
  }
  func.func @transform_2(%arg0: i32, %arg1: i32) -> (i32, i32, i32) {
    %c0_i32 = arith.constant 0 : i32
    %c0_i32_0 = arith.constant 0 : i32
    return %arg0, %c0_i32, %arg1 : i32, i32, i32
  }
  func.func @transform_3(%arg0: i32, %arg1: i32) -> (i32, i32, i32) {
    %c0_i32 = arith.constant 0 : i32
    %c0_i32_0 = arith.constant 0 : i32
    %c0_i32_1 = arith.constant 0 : i32
    return %arg0, %c0_i32, %c0_i32_0 : i32, i32, i32
  }
  func.func @transform_4(%arg0: i32, %arg1: i32) -> (i32, i32, i32) {
    %c0_i32 = arith.constant 0 : i32
    %c0_i32_0 = arith.constant 0 : i32
    %c0_i32_1 = arith.constant 0 : i32
    return %arg0, %c0_i32, %c0_i32_0 : i32, i32, i32
  }
}

module attributes {stable_mosaic.version = 11 : i64} {
  func.func @bn_act_residual_kernel(%arg0: i32, %arg1: i32, %arg2: memref<1x4x128xf32, #tpu.memory_space<vmem>>, %arg3: memref<1x4x128xf32, #tpu.memory_space<vmem>>, %arg4: memref<4x1xf32, #tpu.memory_space<vmem>>, %arg5: memref<4x1xf32, #tpu.memory_space<vmem>>, %arg6: memref<1x4x128xf32, #tpu.memory_space<vmem>>) attributes {dimension_semantics = [#tpu.dimension_semantics<parallel>, #tpu.dimension_semantics<parallel>], iteration_bounds = array<i64: 2, 2>, scalar_prefetch = 0 : i64, scratch_operands = 0 : i64, tpu.core_type = #tpu.core_type<tc>, window_params = [{transform_indices = @transform_0, window_bounds = array<i64: 1, 4, 128>}, {transform_indices = @transform_1, window_bounds = array<i64: 1, 4, 128>}, {pipeline_mode = #tpu.pipeline_mode<synchronous>, transform_indices = @transform_2, window_bounds = array<i64: 4, 1>}, {pipeline_mode = #tpu.pipeline_mode<synchronous>, transform_indices = @transform_3, window_bounds = array<i64: 4, 1>}, {transform_indices = @transform_4, window_bounds = array<i64: 1, 4, 128>}]} {
    %c0 = arith.constant 0 : index
    %c0_0 = arith.constant 0 : index
    %c0_1 = arith.constant 0 : index
    %0 = vector.load %arg2[%c0, %c0_0, %c0_1] : memref<1x4x128xf32, #tpu.memory_space<vmem>>, vector<1x4x128xf32>
    %1 = vector.shape_cast %0 : vector<1x4x128xf32> to vector<4x128xf32>
    %c0_2 = arith.constant 0 : index
    %c0_3 = arith.constant 0 : index
    %2 = vector.load %arg4[%c0_2, %c0_3] : memref<4x1xf32, #tpu.memory_space<vmem>>, vector<4x1xf32>
    %3 = vector.broadcast %2 : vector<4x1xf32> to vector<4x128xf32>
    %4 = arith.mulf %1, %3 : vector<4x128xf32>
    %c0_4 = arith.constant 0 : index
    %c0_5 = arith.constant 0 : index
    %5 = vector.load %arg5[%c0_4, %c0_5] : memref<4x1xf32, #tpu.memory_space<vmem>>, vector<4x1xf32>
    %6 = vector.broadcast %5 : vector<4x1xf32> to vector<4x128xf32>
    %7 = arith.addf %4, %6 : vector<4x128xf32>
    %cst = arith.constant 3.000000e+00 : f32
    %8 = vector.broadcast %cst : f32 to vector<4x128xf32>
    %9 = arith.addf %7, %8 : vector<4x128xf32>
    %cst_6 = arith.constant 0.000000e+00 : f32
    %10 = vector.broadcast %cst_6 : f32 to vector<4x128xf32>
    %11 = arith.maximumf %9, %10 : vector<4x128xf32>
    %cst_7 = arith.constant 6.000000e+00 : f32
    %12 = vector.broadcast %cst_7 : f32 to vector<4x128xf32>
    %13 = arith.minimumf %11, %12 : vector<4x128xf32>
    %14 = arith.mulf %7, %13 : vector<4x128xf32>
    %cst_8 = arith.constant 0.166666672 : f32
    %15 = vector.broadcast %cst_8 : f32 to vector<4x128xf32>
    %16 = arith.mulf %14, %15 : vector<4x128xf32>
    %c0_9 = arith.constant 0 : index
    %c0_10 = arith.constant 0 : index
    %c0_11 = arith.constant 0 : index
    %17 = vector.load %arg3[%c0_9, %c0_10, %c0_11] : memref<1x4x128xf32, #tpu.memory_space<vmem>>, vector<1x4x128xf32>
    %18 = vector.shape_cast %17 : vector<1x4x128xf32> to vector<4x128xf32>
    %19 = arith.addf %16, %18 : vector<4x128xf32>
    %c0_12 = arith.constant 0 : index
    %c0_13 = arith.constant 0 : index
    %c0_14 = arith.constant 0 : index
    %20 = vector.load %arg6[%c0_12, %c0_13, %c0_14] : memref<1x4x128xf32, #tpu.memory_space<vmem>>, vector<1x4x128xf32>
    %21 = vector.shape_cast %20 : vector<1x4x128xf32> to vector<4x128xf32>
    %22 = vector.shape_cast %19 : vector<4x128xf32> to vector<1x4x128xf32>
    tpu.vector_store %arg6[%c0_12, %c0_13, %c0_14], %22 {strides = array<i32>} : memref<1x4x128xf32, #tpu.memory_space<vmem>>, vector<1x4x128xf32>,
    return
  }
  func.func @transform_0(%arg0: i32, %arg1: i32) -> (i32, i32, i32) {
    %c0_i32 = arith.constant 0 : i32
    %c0_i32_0 = arith.constant 0 : i32
    return %arg0, %c0_i32, %arg1 : i32, i32, i32
  }
  func.func @transform_1(%arg0: i32, %arg1: i32) -> (i32, i32, i32) {
    %c0_i32 = arith.constant 0 : i32
    %c0_i32_0 = arith.constant 0 : i32
    return %arg0, %c0_i32, %arg1 : i32, i32, i32
  }
  func.func @transform_2(%arg0: i32, %arg1: i32) -> (i32, i32) {
    %c0_i32 = arith.constant 0 : i32
    %c0_i32_0 = arith.constant 0 : i32
    %c0_i32_1 = arith.constant 0 : i32
    return %c0_i32, %c0_i32_0 : i32, i32
  }
  func.func @transform_3(%arg0: i32, %arg1: i32) -> (i32, i32) {
    %c0_i32 = arith.constant 0 : i32
    %c0_i32_0 = arith.constant 0 : i32
    %c0_i32_1 = arith.constant 0 : i32
    return %c0_i32, %c0_i32_0 : i32, i32
  }
  func.func @transform_4(%arg0: i32, %arg1: i32) -> (i32, i32, i32) {
    %c0_i32 = arith.constant 0 : i32
    %c0_i32_0 = arith.constant 0 : i32
    return %arg0, %c0_i32, %arg1 : i32, i32, i32
  }
}

module attributes {stable_mosaic.version = 11 : i64} {
  func.func @conv3x3_stats_kernel(%arg0: i32, %arg1: memref<1x4x256xf32, #tpu.memory_space<vmem>>, %arg2: memref<4x1xf32, #tpu.memory_space<vmem>>, %arg3: memref<4x1xf32, #tpu.memory_space<vmem>>, %arg4: memref<3x3x4x4xf32, #tpu.memory_space<vmem>>, %arg5: memref<1x256xi32, #tpu.memory_space<vmem>>, %arg6: memref<1x4x256xf32, #tpu.memory_space<vmem>>, %arg7: memref<1x4x1xf32, #tpu.memory_space<vmem>>, %arg8: memref<1x4x1xf32, #tpu.memory_space<vmem>>) attributes {dimension_semantics = [#tpu.dimension_semantics<parallel>], iteration_bounds = array<i64: 2>, scalar_prefetch = 0 : i64, scratch_operands = 0 : i64, tpu.core_type = #tpu.core_type<tc>, window_params = [{transform_indices = @transform_0, window_bounds = array<i64: 1, 4, 256>}, {pipeline_mode = #tpu.pipeline_mode<synchronous>, transform_indices = @transform_1, window_bounds = array<i64: 4, 1>}, {pipeline_mode = #tpu.pipeline_mode<synchronous>, transform_indices = @transform_2, window_bounds = array<i64: 4, 1>}, {pipeline_mode = #tpu.pipeline_mode<synchronous>, transform_indices = @transform_3, window_bounds = array<i64: 3, 3, 4, 4>}, {pipeline_mode = #tpu.pipeline_mode<synchronous>, transform_indices = @transform_4, window_bounds = array<i64: 1, 256>}, {transform_indices = @transform_5, window_bounds = array<i64: 1, 4, 256>}, {transform_indices = @transform_6, window_bounds = array<i64: 1, 4, 1>}, {transform_indices = @transform_7, window_bounds = array<i64: 1, 4, 1>}]} {
    %c0 = arith.constant 0 : index
    %c0_0 = arith.constant 0 : index
    %c0_1 = arith.constant 0 : index
    %0 = vector.load %arg1[%c0, %c0_0, %c0_1] : memref<1x4x256xf32, #tpu.memory_space<vmem>>, vector<1x4x256xf32>
    %1 = vector.shape_cast %0 : vector<1x4x256xf32> to vector<4x256xf32>
    %c0_2 = arith.constant 0 : index
    %c0_3 = arith.constant 0 : index
    %2 = vector.load %arg2[%c0_2, %c0_3] : memref<4x1xf32, #tpu.memory_space<vmem>>, vector<4x1xf32>
    %3 = vector.broadcast %2 : vector<4x1xf32> to vector<4x256xf32>
    %4 = arith.mulf %1, %3 : vector<4x256xf32>
    %c0_4 = arith.constant 0 : index
    %c0_5 = arith.constant 0 : index
    %5 = vector.load %arg3[%c0_4, %c0_5] : memref<4x1xf32, #tpu.memory_space<vmem>>, vector<4x1xf32>
    %6 = vector.broadcast %5 : vector<4x1xf32> to vector<4x256xf32>
    %7 = arith.addf %4, %6 : vector<4x256xf32>
    %cst = arith.constant 3.000000e+00 : f32
    %8 = vector.broadcast %cst : f32 to vector<4x256xf32>
    %9 = arith.addf %7, %8 : vector<4x256xf32>
    %cst_6 = arith.constant 0.000000e+00 : f32
    %10 = vector.broadcast %cst_6 : f32 to vector<4x256xf32>
    %11 = arith.maximumf %9, %10 : vector<4x256xf32>
    %cst_7 = arith.constant 6.000000e+00 : f32
    %12 = vector.broadcast %cst_7 : f32 to vector<4x256xf32>
    %13 = arith.minimumf %11, %12 : vector<4x256xf32>
    %14 = arith.mulf %7, %13 : vector<4x256xf32>
    %cst_8 = arith.constant 0.166666672 : f32
    %15 = vector.broadcast %cst_8 : f32 to vector<4x256xf32>
    %16 = arith.mulf %14, %15 : vector<4x256xf32>
    %c0_9 = arith.constant 0 : index
    %c0_10 = arith.constant 0 : index
    %17 = vector.load %arg5[%c0_9, %c0_10] : memref<1x256xi32, #tpu.memory_space<vmem>>, vector<1x256xi32>
    %cst_11 = arith.constant 0.000000e+00 : f32
    %18 = vector.broadcast %cst_11 : f32 to vector<4x256xf32>
    %cst_12 = arith.constant 0.000000e+00 : f32
    %19 = vector.broadcast %cst_12 : f32 to vector<4x17xf32>
    %20 = vector.extract_strided_slice %16 {offsets = [0, 0], sizes = [4, 239], strides = [1, 1]} : vector<4x256xf32> to vector<4x239xf32>
    %21 = tpu.concatenate %19, %20 in 1 : vector<4x17xf32>, vector<4x239xf32> -> vector<4x256xf32>
    %c-1_i32 = arith.constant -1 : i32
    %22 = vector.broadcast %c-1_i32 : i32 to vector<1x256xi32>
    %23 = arith.addi %17, %22 : vector<1x256xi32>
    %c0_i32 = arith.constant 0 : i32
    %24 = vector.broadcast %c0_i32 : i32 to vector<1x256xi32>
    %25 = arith.cmpi sge, %23, %24 : vector<1x256xi32>
    %c-1_i32_13 = arith.constant -1 : i32
    %26 = vector.broadcast %c-1_i32_13 : i32 to vector<1x256xi32>
    %27 = arith.addi %17, %26 : vector<1x256xi32>
    %c16_i32 = arith.constant 16 : i32
    %28 = vector.broadcast %c16_i32 : i32 to vector<1x256xi32>
    %29 = arith.cmpi slt, %27, %28 : vector<1x256xi32>
    %30 = arith.andi %25, %29 : vector<1x256xi1>
    %cst_14 = arith.constant 0.000000e+00 : f32
    %31 = vector.shape_cast %30 : vector<1x256xi1> to vector<1x256xi1>
    %32 = vector.broadcast %31 : vector<1x256xi1> to vector<4x256xi1>
    %33 = vector.broadcast %cst_14 : f32 to vector<4x256xf32>
    %34 = arith.select %32, %21, %33 : vector<4x256xi1>, vector<4x256xf32>
    %c0_15 = arith.constant 0 : index
    %c0_16 = arith.constant 0 : index
    %c0_17 = arith.constant 0 : index
    %c0_18 = arith.constant 0 : index
    %35 = vector.load %arg4[%c0_15, %c0_16, %c0_17, %c0_18] : memref<3x3x4x4xf32, #tpu.memory_space<vmem>>, vector<1x1x4x4xf32>
    %36 = vector.shape_cast %35 : vector<1x1x4x4xf32> to vector<4x4xf32>
    %cst_19 = arith.constant dense<0.000000e+00> : vector<4x256xf32>
    %37 = tpu.matmul %36, %34, %cst_19 {dimension_numbers = #tpu.dot_dimension_numbers<[1], [0], [0], [1], [0, 0, 1, 1], [], []>} : vector<4x4xf32>, vector<4x256xf32>, vector<4x256xf32> -> vector<4x256xf32>
    %38 = arith.addf %18, %37 : vector<4x256xf32>
    %cst_20 = arith.constant 0.000000e+00 : f32
    %39 = vector.broadcast %cst_20 : f32 to vector<4x16xf32>
    %40 = vector.extract_strided_slice %16 {offsets = [0, 0], sizes = [4, 240], strides = [1, 1]} : vector<4x256xf32> to vector<4x240xf32>
    %41 = tpu.concatenate %39, %40 in 1 : vector<4x16xf32>, vector<4x240xf32> -> vector<4x256xf32>
    %c0_21 = arith.constant 0 : index
    %c1 = arith.constant 1 : index
    %c0_22 = arith.constant 0 : index
    %c0_23 = arith.constant 0 : index
    %42 = vector.load %arg4[%c0_21, %c1, %c0_22, %c0_23] : memref<3x3x4x4xf32, #tpu.memory_space<vmem>>, vector<1x1x4x4xf32>
    %43 = vector.shape_cast %42 : vector<1x1x4x4xf32> to vector<4x4xf32>
    %cst_24 = arith.constant dense<0.000000e+00> : vector<4x256xf32>
    %44 = tpu.matmul %43, %41, %cst_24 {dimension_numbers = #tpu.dot_dimension_numbers<[1], [0], [0], [1], [0, 0, 1, 1], [], []>} : vector<4x4xf32>, vector<4x256xf32>, vector<4x256xf32> -> vector<4x256xf32>
    %45 = arith.addf %38, %44 : vector<4x256xf32>
    %cst_25 = arith.constant 0.000000e+00 : f32
    %46 = vector.broadcast %cst_25 : f32 to vector<4x15xf32>
    %47 = vector.extract_strided_slice %16 {offsets = [0, 0], sizes = [4, 241], strides = [1, 1]} : vector<4x256xf32> to vector<4x241xf32>
    %48 = tpu.concatenate %46, %47 in 1 : vector<4x15xf32>, vector<4x241xf32> -> vector<4x256xf32>
    %c1_i32 = arith.constant 1 : i32
    %49 = vector.broadcast %c1_i32 : i32 to vector<1x256xi32>
    %50 = arith.addi %17, %49 : vector<1x256xi32>
    %c0_i32_26 = arith.constant 0 : i32
    %51 = vector.broadcast %c0_i32_26 : i32 to vector<1x256xi32>
    %52 = arith.cmpi sge, %50, %51 : vector<1x256xi32>
    %c1_i32_27 = arith.constant 1 : i32
    %53 = vector.broadcast %c1_i32_27 : i32 to vector<1x256xi32>
    %54 = arith.addi %17, %53 : vector<1x256xi32>
    %c16_i32_28 = arith.constant 16 : i32
    %55 = vector.broadcast %c16_i32_28 : i32 to vector<1x256xi32>
    %56 = arith.cmpi slt, %54, %55 : vector<1x256xi32>
    %57 = arith.andi %52, %56 : vector<1x256xi1>
    %cst_29 = arith.constant 0.000000e+00 : f32
    %58 = vector.shape_cast %57 : vector<1x256xi1> to vector<1x256xi1>
    %59 = vector.broadcast %58 : vector<1x256xi1> to vector<4x256xi1>
    %60 = vector.broadcast %cst_29 : f32 to vector<4x256xf32>
    %61 = arith.select %59, %48, %60 : vector<4x256xi1>, vector<4x256xf32>
    %c0_30 = arith.constant 0 : index
    %c2 = arith.constant 2 : index
    %c0_31 = arith.constant 0 : index
    %c0_32 = arith.constant 0 : index
    %62 = vector.load %arg4[%c0_30, %c2, %c0_31, %c0_32] : memref<3x3x4x4xf32, #tpu.memory_space<vmem>>, vector<1x1x4x4xf32>
    %63 = vector.shape_cast %62 : vector<1x1x4x4xf32> to vector<4x4xf32>
    %cst_33 = arith.constant dense<0.000000e+00> : vector<4x256xf32>
    %64 = tpu.matmul %63, %61, %cst_33 {dimension_numbers = #tpu.dot_dimension_numbers<[1], [0], [0], [1], [0, 0, 1, 1], [], []>} : vector<4x4xf32>, vector<4x256xf32>, vector<4x256xf32> -> vector<4x256xf32>
    %65 = arith.addf %45, %64 : vector<4x256xf32>
    %cst_34 = arith.constant 0.000000e+00 : f32
    %66 = vector.broadcast %cst_34 : f32 to vector<4x1xf32>
    %67 = vector.extract_strided_slice %16 {offsets = [0, 0], sizes = [4, 255], strides = [1, 1]} : vector<4x256xf32> to vector<4x255xf32>
    %68 = tpu.concatenate %66, %67 in 1 : vector<4x1xf32>, vector<4x255xf32> -> vector<4x256xf32>
    %c-1_i32_35 = arith.constant -1 : i32
    %69 = vector.broadcast %c-1_i32_35 : i32 to vector<1x256xi32>
    %70 = arith.addi %17, %69 : vector<1x256xi32>
    %c0_i32_36 = arith.constant 0 : i32
    %71 = vector.broadcast %c0_i32_36 : i32 to vector<1x256xi32>
    %72 = arith.cmpi sge, %70, %71 : vector<1x256xi32>
    %c-1_i32_37 = arith.constant -1 : i32
    %73 = vector.broadcast %c-1_i32_37 : i32 to vector<1x256xi32>
    %74 = arith.addi %17, %73 : vector<1x256xi32>
    %c16_i32_38 = arith.constant 16 : i32
    %75 = vector.broadcast %c16_i32_38 : i32 to vector<1x256xi32>
    %76 = arith.cmpi slt, %74, %75 : vector<1x256xi32>
    %77 = arith.andi %72, %76 : vector<1x256xi1>
    %cst_39 = arith.constant 0.000000e+00 : f32
    %78 = vector.shape_cast %77 : vector<1x256xi1> to vector<1x256xi1>
    %79 = vector.broadcast %78 : vector<1x256xi1> to vector<4x256xi1>
    %80 = vector.broadcast %cst_39 : f32 to vector<4x256xf32>
    %81 = arith.select %79, %68, %80 : vector<4x256xi1>, vector<4x256xf32>
    %c1_40 = arith.constant 1 : index
    %c0_41 = arith.constant 0 : index
    %c0_42 = arith.constant 0 : index
    %c0_43 = arith.constant 0 : index
    %82 = vector.load %arg4[%c1_40, %c0_41, %c0_42, %c0_43] : memref<3x3x4x4xf32, #tpu.memory_space<vmem>>, vector<1x1x4x4xf32>
    %83 = vector.shape_cast %82 : vector<1x1x4x4xf32> to vector<4x4xf32>
    %cst_44 = arith.constant dense<0.000000e+00> : vector<4x256xf32>
    %84 = tpu.matmul %83, %81, %cst_44 {dimension_numbers = #tpu.dot_dimension_numbers<[1], [0], [0], [1], [0, 0, 1, 1], [], []>} : vector<4x4xf32>, vector<4x256xf32>, vector<4x256xf32> -> vector<4x256xf32>
    %85 = arith.addf %65, %84 : vector<4x256xf32>
    %c1_45 = arith.constant 1 : index
    %c1_46 = arith.constant 1 : index
    %c0_47 = arith.constant 0 : index
    %c0_48 = arith.constant 0 : index
    %86 = vector.load %arg4[%c1_45, %c1_46, %c0_47, %c0_48] : memref<3x3x4x4xf32, #tpu.memory_space<vmem>>, vector<1x1x4x4xf32>
    %87 = vector.shape_cast %86 : vector<1x1x4x4xf32> to vector<4x4xf32>
    %cst_49 = arith.constant dense<0.000000e+00> : vector<4x256xf32>
    %88 = tpu.matmul %87, %16, %cst_49 {dimension_numbers = #tpu.dot_dimension_numbers<[1], [0], [0], [1], [0, 0, 1, 1], [], []>} : vector<4x4xf32>, vector<4x256xf32>, vector<4x256xf32> -> vector<4x256xf32>
    %89 = arith.addf %85, %88 : vector<4x256xf32>
    %cst_50 = arith.constant 0.000000e+00 : f32
    %90 = vector.broadcast %cst_50 : f32 to vector<4x1xf32>
    %91 = vector.extract_strided_slice %16 {offsets = [0, 1], sizes = [4, 255], strides = [1, 1]} : vector<4x256xf32> to vector<4x255xf32>
    %92 = tpu.concatenate %91, %90 in 1 : vector<4x255xf32>, vector<4x1xf32> -> vector<4x256xf32>
    %c1_i32_51 = arith.constant 1 : i32
    %93 = vector.broadcast %c1_i32_51 : i32 to vector<1x256xi32>
    %94 = arith.addi %17, %93 : vector<1x256xi32>
    %c0_i32_52 = arith.constant 0 : i32
    %95 = vector.broadcast %c0_i32_52 : i32 to vector<1x256xi32>
    %96 = arith.cmpi sge, %94, %95 : vector<1x256xi32>
    %c1_i32_53 = arith.constant 1 : i32
    %97 = vector.broadcast %c1_i32_53 : i32 to vector<1x256xi32>
    %98 = arith.addi %17, %97 : vector<1x256xi32>
    %c16_i32_54 = arith.constant 16 : i32
    %99 = vector.broadcast %c16_i32_54 : i32 to vector<1x256xi32>
    %100 = arith.cmpi slt, %98, %99 : vector<1x256xi32>
    %101 = arith.andi %96, %100 : vector<1x256xi1>
    %cst_55 = arith.constant 0.000000e+00 : f32
    %102 = vector.shape_cast %101 : vector<1x256xi1> to vector<1x256xi1>
    %103 = vector.broadcast %102 : vector<1x256xi1> to vector<4x256xi1>
    %104 = vector.broadcast %cst_55 : f32 to vector<4x256xf32>
    %105 = arith.select %103, %92, %104 : vector<4x256xi1>, vector<4x256xf32>
    %c1_56 = arith.constant 1 : index
    %c2_57 = arith.constant 2 : index
    %c0_58 = arith.constant 0 : index
    %c0_59 = arith.constant 0 : index
    %106 = vector.load %arg4[%c1_56, %c2_57, %c0_58, %c0_59] : memref<3x3x4x4xf32, #tpu.memory_space<vmem>>, vector<1x1x4x4xf32>
    %107 = vector.shape_cast %106 : vector<1x1x4x4xf32> to vector<4x4xf32>
    %cst_60 = arith.constant dense<0.000000e+00> : vector<4x256xf32>
    %108 = tpu.matmul %107, %105, %cst_60 {dimension_numbers = #tpu.dot_dimension_numbers<[1], [0], [0], [1], [0, 0, 1, 1], [], []>} : vector<4x4xf32>, vector<4x256xf32>, vector<4x256xf32> -> vector<4x256xf32>
    %109 = arith.addf %89, %108 : vector<4x256xf32>
    %cst_61 = arith.constant 0.000000e+00 : f32
    %110 = vector.broadcast %cst_61 : f32 to vector<4x15xf32>
    %111 = vector.extract_strided_slice %16 {offsets = [0, 15], sizes = [4, 241], strides = [1, 1]} : vector<4x256xf32> to vector<4x241xf32>
    %112 = tpu.concatenate %111, %110 in 1 : vector<4x241xf32>, vector<4x15xf32> -> vector<4x256xf32>
    %c-1_i32_62 = arith.constant -1 : i32
    %113 = vector.broadcast %c-1_i32_62 : i32 to vector<1x256xi32>
    %114 = arith.addi %17, %113 : vector<1x256xi32>
    %c0_i32_63 = arith.constant 0 : i32
    %115 = vector.broadcast %c0_i32_63 : i32 to vector<1x256xi32>
    %116 = arith.cmpi sge, %114, %115 : vector<1x256xi32>
    %c-1_i32_64 = arith.constant -1 : i32
    %117 = vector.broadcast %c-1_i32_64 : i32 to vector<1x256xi32>
    %118 = arith.addi %17, %117 : vector<1x256xi32>
    %c16_i32_65 = arith.constant 16 : i32
    %119 = vector.broadcast %c16_i32_65 : i32 to vector<1x256xi32>
    %120 = arith.cmpi slt, %118, %119 : vector<1x256xi32>
    %121 = arith.andi %116, %120 : vector<1x256xi1>
    %cst_66 = arith.constant 0.000000e+00 : f32
    %122 = vector.shape_cast %121 : vector<1x256xi1> to vector<1x256xi1>
    %123 = vector.broadcast %122 : vector<1x256xi1> to vector<4x256xi1>
    %124 = vector.broadcast %cst_66 : f32 to vector<4x256xf32>
    %125 = arith.select %123, %112, %124 : vector<4x256xi1>, vector<4x256xf32>
    %c2_67 = arith.constant 2 : index
    %c0_68 = arith.constant 0 : index
    %c0_69 = arith.constant 0 : index
    %c0_70 = arith.constant 0 : index
    %126 = vector.load %arg4[%c2_67, %c0_68, %c0_69, %c0_70] : memref<3x3x4x4xf32, #tpu.memory_space<vmem>>, vector<1x1x4x4xf32>
    %127 = vector.shape_cast %126 : vector<1x1x4x4xf32> to vector<4x4xf32>
    %cst_71 = arith.constant dense<0.000000e+00> : vector<4x256xf32>
    %128 = tpu.matmul %127, %125, %cst_71 {dimension_numbers = #tpu.dot_dimension_numbers<[1], [0], [0], [1], [0, 0, 1, 1], [], []>} : vector<4x4xf32>, vector<4x256xf32>, vector<4x256xf32> -> vector<4x256xf32>
    %129 = arith.addf %109, %128 : vector<4x256xf32>
    %cst_72 = arith.constant 0.000000e+00 : f32
    %130 = vector.broadcast %cst_72 : f32 to vector<4x16xf32>
    %131 = vector.extract_strided_slice %16 {offsets = [0, 16], sizes = [4, 240], strides = [1, 1]} : vector<4x256xf32> to vector<4x240xf32>
    %132 = tpu.concatenate %131, %130 in 1 : vector<4x240xf32>, vector<4x16xf32> -> vector<4x256xf32>
    %c2_73 = arith.constant 2 : index
    %c1_74 = arith.constant 1 : index
    %c0_75 = arith.constant 0 : index
    %c0_76 = arith.constant 0 : index
    %133 = vector.load %arg4[%c2_73, %c1_74, %c0_75, %c0_76] : memref<3x3x4x4xf32, #tpu.memory_space<vmem>>, vector<1x1x4x4xf32>
    %134 = vector.shape_cast %133 : vector<1x1x4x4xf32> to vector<4x4xf32>
    %cst_77 = arith.constant dense<0.000000e+00> : vector<4x256xf32>
    %135 = tpu.matmul %134, %132, %cst_77 {dimension_numbers = #tpu.dot_dimension_numbers<[1], [0], [0], [1], [0, 0, 1, 1], [], []>} : vector<4x4xf32>, vector<4x256xf32>, vector<4x256xf32> -> vector<4x256xf32>
    %136 = arith.addf %129, %135 : vector<4x256xf32>
    %cst_78 = arith.constant 0.000000e+00 : f32
    %137 = vector.broadcast %cst_78 : f32 to vector<4x17xf32>
    %138 = vector.extract_strided_slice %16 {offsets = [0, 17], sizes = [4, 239], strides = [1, 1]} : vector<4x256xf32> to vector<4x239xf32>
    %139 = tpu.concatenate %138, %137 in 1 : vector<4x239xf32>, vector<4x17xf32> -> vector<4x256xf32>
    %c1_i32_79 = arith.constant 1 : i32
    %140 = vector.broadcast %c1_i32_79 : i32 to vector<1x256xi32>
    %141 = arith.addi %17, %140 : vector<1x256xi32>
    %c0_i32_80 = arith.constant 0 : i32
    %142 = vector.broadcast %c0_i32_80 : i32 to vector<1x256xi32>
    %143 = arith.cmpi sge, %141, %142 : vector<1x256xi32>
    %c1_i32_81 = arith.constant 1 : i32
    %144 = vector.broadcast %c1_i32_81 : i32 to vector<1x256xi32>
    %145 = arith.addi %17, %144 : vector<1x256xi32>
    %c16_i32_82 = arith.constant 16 : i32
    %146 = vector.broadcast %c16_i32_82 : i32 to vector<1x256xi32>
    %147 = arith.cmpi slt, %145, %146 : vector<1x256xi32>
    %148 = arith.andi %143, %147 : vector<1x256xi1>
    %cst_83 = arith.constant 0.000000e+00 : f32
    %149 = vector.shape_cast %148 : vector<1x256xi1> to vector<1x256xi1>
    %150 = vector.broadcast %149 : vector<1x256xi1> to vector<4x256xi1>
    %151 = vector.broadcast %cst_83 : f32 to vector<4x256xf32>
    %152 = arith.select %150, %139, %151 : vector<4x256xi1>, vector<4x256xf32>
    %c2_84 = arith.constant 2 : index
    %c2_85 = arith.constant 2 : index
    %c0_86 = arith.constant 0 : index
    %c0_87 = arith.constant 0 : index
    %153 = vector.load %arg4[%c2_84, %c2_85, %c0_86, %c0_87] : memref<3x3x4x4xf32, #tpu.memory_space<vmem>>, vector<1x1x4x4xf32>
    %154 = vector.shape_cast %153 : vector<1x1x4x4xf32> to vector<4x4xf32>
    %cst_88 = arith.constant dense<0.000000e+00> : vector<4x256xf32>
    %155 = tpu.matmul %154, %152, %cst_88 {dimension_numbers = #tpu.dot_dimension_numbers<[1], [0], [0], [1], [0, 0, 1, 1], [], []>} : vector<4x4xf32>, vector<4x256xf32>, vector<4x256xf32> -> vector<4x256xf32>
    %156 = arith.addf %136, %155 : vector<4x256xf32>
    %c0_89 = arith.constant 0 : index
    %c0_90 = arith.constant 0 : index
    %c0_91 = arith.constant 0 : index
    %157 = vector.load %arg6[%c0_89, %c0_90, %c0_91] : memref<1x4x256xf32, #tpu.memory_space<vmem>>, vector<1x4x256xf32>
    %158 = vector.shape_cast %157 : vector<1x4x256xf32> to vector<4x256xf32>
    %159 = vector.shape_cast %156 : vector<4x256xf32> to vector<1x4x256xf32>
    tpu.vector_store %arg6[%c0_89, %c0_90, %c0_91], %159 {strides = array<i32>} : memref<1x4x256xf32, #tpu.memory_space<vmem>>, vector<1x4x256xf32>,
    %cst_92 = arith.constant dense<0.000000e+00> : vector<4xf32>
    %160 = vector.multi_reduction <add>, %156, %cst_92 [1] : vector<4x256xf32> to vector<4xf32>
    %161 = vector.shape_cast %160 : vector<4xf32> to vector<4x1xf32>
    %c0_93 = arith.constant 0 : index
    %c0_94 = arith.constant 0 : index
    %c0_95 = arith.constant 0 : index
    %162 = vector.load %arg7[%c0_93, %c0_94, %c0_95] : memref<1x4x1xf32, #tpu.memory_space<vmem>>, vector<1x4x1xf32>
    %163 = vector.shape_cast %162 : vector<1x4x1xf32> to vector<4x1xf32>
    %164 = vector.shape_cast %161 : vector<4x1xf32> to vector<1x4x1xf32>
    tpu.vector_store %arg7[%c0_93, %c0_94, %c0_95], %164 {strides = array<i32>} : memref<1x4x1xf32, #tpu.memory_space<vmem>>, vector<1x4x1xf32>,
    %165 = arith.mulf %156, %156 : vector<4x256xf32>
    %cst_96 = arith.constant dense<0.000000e+00> : vector<4xf32>
    %166 = vector.multi_reduction <add>, %165, %cst_96 [1] : vector<4x256xf32> to vector<4xf32>
    %167 = vector.shape_cast %166 : vector<4xf32> to vector<4x1xf32>
    %c0_97 = arith.constant 0 : index
    %c0_98 = arith.constant 0 : index
    %c0_99 = arith.constant 0 : index
    %168 = vector.load %arg8[%c0_97, %c0_98, %c0_99] : memref<1x4x1xf32, #tpu.memory_space<vmem>>, vector<1x4x1xf32>
    %169 = vector.shape_cast %168 : vector<1x4x1xf32> to vector<4x1xf32>
    %170 = vector.shape_cast %167 : vector<4x1xf32> to vector<1x4x1xf32>
    tpu.vector_store %arg8[%c0_97, %c0_98, %c0_99], %170 {strides = array<i32>} : memref<1x4x1xf32, #tpu.memory_space<vmem>>, vector<1x4x1xf32>,
    return
  }
  func.func @transform_0(%arg0: i32) -> (i32, i32, i32) {
    %c0_i32 = arith.constant 0 : i32
    %c0_i32_0 = arith.constant 0 : i32
    %c0_i32_1 = arith.constant 0 : i32
    return %arg0, %c0_i32, %c0_i32_0 : i32, i32, i32
  }
  func.func @transform_1(%arg0: i32) -> (i32, i32) {
    %c0_i32 = arith.constant 0 : i32
    %c0_i32_0 = arith.constant 0 : i32
    %c0_i32_1 = arith.constant 0 : i32
    return %c0_i32, %c0_i32_0 : i32, i32
  }
  func.func @transform_2(%arg0: i32) -> (i32, i32) {
    %c0_i32 = arith.constant 0 : i32
    %c0_i32_0 = arith.constant 0 : i32
    %c0_i32_1 = arith.constant 0 : i32
    return %c0_i32, %c0_i32_0 : i32, i32
  }
  func.func @transform_3(%arg0: i32) -> (i32, i32, i32, i32) {
    %c0_i32 = arith.constant 0 : i32
    %c0_i32_0 = arith.constant 0 : i32
    %c0_i32_1 = arith.constant 0 : i32
    %c0_i32_2 = arith.constant 0 : i32
    %c0_i32_3 = arith.constant 0 : i32
    return %c0_i32, %c0_i32_0, %c0_i32_1, %c0_i32_2 : i32, i32, i32, i32
  }
  func.func @transform_4(%arg0: i32) -> (i32, i32) {
    %c0_i32 = arith.constant 0 : i32
    %c0_i32_0 = arith.constant 0 : i32
    %c0_i32_1 = arith.constant 0 : i32
    return %c0_i32, %c0_i32_0 : i32, i32
  }
  func.func @transform_5(%arg0: i32) -> (i32, i32, i32) {
    %c0_i32 = arith.constant 0 : i32
    %c0_i32_0 = arith.constant 0 : i32
    %c0_i32_1 = arith.constant 0 : i32
    return %arg0, %c0_i32, %c0_i32_0 : i32, i32, i32
  }
  func.func @transform_6(%arg0: i32) -> (i32, i32, i32) {
    %c0_i32 = arith.constant 0 : i32
    %c0_i32_0 = arith.constant 0 : i32
    %c0_i32_1 = arith.constant 0 : i32
    return %arg0, %c0_i32, %c0_i32_0 : i32, i32, i32
  }
  func.func @transform_7(%arg0: i32) -> (i32, i32, i32) {
    %c0_i32 = arith.constant 0 : i32
    %c0_i32_0 = arith.constant 0 : i32
    %c0_i32_1 = arith.constant 0 : i32
    return %arg0, %c0_i32, %c0_i32_0 : i32, i32, i32
  }
}

</mosaic_0001>

<bundles_post_ra>
// kernel: tile.9
= control target key start
LH: loop header
LB: loop body
LE: loop exit
PB: predicated region body
PF: predicated region fallthrough
CT: control target
= control target key end

     0   :  { %s7_s6 = smov 3  ;;  %s21_s9 = smov 3  ;;  %vm4_vm0 = vcmask 130048   ;;  %vm11_vm1 = vcmask 1048448   ;;  %vm18_vm2 = vcmask 917248   ;;  %vm25_vm3 = vcmask 786048   ;;  %s129_s0 = inlined_call_operand.vmem [shape: s32[16,16], index: 0, kind: input, shape index: {}]   ;;  %s130_s1 = inlined_call_operand.vmem [shape: s32[1,256], index: 1, kind: output, shape index: {}]  }
   0x1   :  { %v67_v0 = vld [vmem:[%s129_s0 + $0x7] ss:$8 sm:%s7_s6]   ;;  %s82_s10 = smov 112   ;;  %v69_v1 = vld [vmem:[%s129_s0 + $0x5] ss:$8 sm:%s21_s9]   ;;  %s83_s13 = smov 80  }
   0x2   :  { %9 = vrot.lane.b32.xlu0 %v67_v0, %s82_s10  ;;  %23 = vrot.lane.b32.xlu1 %v69_v1, %s83_s13  ;;  %s14_s14 = smov 3  ;;  %s28_s15 = smov 3  ;;  %vm32_vm4 = vcmask 654848   ;;  %vm39_vm5 = vcmask 523648   ;;  %vm46_vm6 = vcmask 392448   ;;  %vm53_vm7 = vcmask 261248  }
   0x3   :  { %s35_s16 = smov 3  ;;  %v68_v3 = vld [vmem:[%s129_s0 + $0x6] ss:$8 sm:%s14_s14]   ;;  %s84_s21 = smov 48   ;;  %v70_v4 = vld [vmem:[%s129_s0 + $0x4] ss:$8 sm:%s28_s15]  }
   0x4   :  { %v71_v2 = vld [vmem:[%s129_s0 + $0x3] ss:$8 sm:%s35_s16]   ;;  %s42_s24 = smov 3  ;;  %s85_s25 = smov 96  }
   0x5   :  { %37 = vrot.lane.b32.xlu2 %v71_v2, %s84_s21  ;;  %s86_s26 = smov 64   ;;  %s49_s27 = smov 3  ;;  %v72_v5 = vld [vmem:[%s129_s0 + $0x2] ss:$8 sm:%s42_s24]  }
   0x6   :  { %v73_v6 = vld [vmem:[%s129_s0 + $0x1] ss:$8 sm:%s49_s27]   ;;  %s87_s3 = smov 32   ;;  %s88_s4 = smov 16  }
   0x7   :  { %s2_s5 = smov 3 }
   0x8   :  { %v3_v7 = vld [vmem:[%s129_s0] ss:$8 sm:%s2_s5]  }
   0x9   :  { %5 = vst.msk [vmem:[#allocation0] ss:$8 sm:$0x3] %vm4_vm0, %v3_v7  }
   0xa   :  { %16 = vrot.lane.b32.xlu0 %v68_v3, %s85_s25  ;;  %30 = vrot.lane.b32.xlu1 %v70_v4, %s86_s26 }
   0xd   :  { %44 = vrot.lane.b32.xlu2 %v72_v5, %s87_s3 }
  0x12   :  { %51 = vrot.lane.b32.xlu0 %v73_v6, %s88_s4 }
  0x5f   :  { %v38_v8 = vpop.permute.xlu2 %37  }
  0x67   :  { %v45_v9 = vpop.permute.xlu2 %44  }
  0x74   :  { %v10_v10 = vpop.permute.xlu0 %9   ;;  %v24_v11 = vpop.permute.xlu1 %23  }
  0x75   :  { %12 = vst.msk [vmem:[#allocation0] ss:$8 sm:$0x3] %vm11_vm1, %v10_v10  }
  0x7c   :  { %v17_v12 = vpop.permute.xlu0 %16   ;;  %v31_v13 = vpop.permute.xlu1 %30  }
  0x7d   :  { %19 = vst.msk [vmem:[#allocation0] ss:$8 sm:$0x3] %vm18_vm2, %v17_v12  }
  0x7e   :  { %26 = vst.msk [vmem:[#allocation0] ss:$8 sm:$0x3] %vm25_vm3, %v24_v11  }
  0x7f   :  { %33 = vst.msk [vmem:[#allocation0] ss:$8 sm:$0x3] %vm32_vm4, %v31_v13  }
  0x80   :  { %40 = vst.msk [vmem:[#allocation0] ss:$8 sm:$0x3] %vm39_vm5, %v38_v8  }
  0x81   :  { %47 = vst.msk [vmem:[#allocation0] ss:$8 sm:$0x3] %vm46_vm6, %v45_v9  }
  0x84   :  { %v52_v14 = vpop.permute.xlu0 %51  }
  0x85   :  { %54 = vst.msk [vmem:[#allocation0] ss:$8 sm:$0x3] %vm53_vm7, %v52_v14  }
  0x8c   :  { %v57_v15 = vld [vmem:[#allocation0] sm:$0x1]  ;;  %v62_v16 = vld [vmem:[#allocation0 + $0x8] sm:$0x1] }
  0x8d   :  { %60 = vst [vmem:[%s130_s1] sm:$0x1] %v57_v15 }
  0x8e   :  { %74 = vst [vmem:[%s130_s1 + $0x1] sm:$0x1] %v62_v16 }

// kernel: bottleneck_forward.5
= control target key start
LH: loop header
LB: loop body
LE: loop exit
PB: predicated region body
PF: predicated region fallthrough
CT: control target
= control target key end

     0   :  { %s508_s15 = smov 0   ;;  %s510_s16 = smov 0   ;;  %s568_s0 = inlined_call_operand.vmem [shape: f32[2,4,256], index: 0, kind: input, shape index: {}]   ;;  %s569_s1 = inlined_call_operand.vmem [shape: f32[2,4,256], index: 1, kind: input, shape index: {}]   ;;  %s570_s2 = inlined_call_operand.vmem [shape: f32[4,1], index: 2, kind: input, shape index: {}]   ;;  %s571_s3 = inlined_call_operand.vmem [shape: f32[4,1], index: 3, kind: input, shape index: {}]   ;;  %s572_s4 = inlined_call_operand.vmem [shape: f32[2,4,256], index: 4, kind: output, shape index: {}]  }
   0x1   :  { %s512_s17 = smov 0   ;;  %s514_s18 = smov 0  }
   0x2   :  { %s516_s19 = smov 0  }
   0x3 LB: > { %s23_s20 = sadd.s32 1, %s472_s17  ;;  %s26_s21 = sadd.s32 1, %s476_s18  ;;  %s480_s19 = sphi %s516_s19, %s14_s19   ;;  %s476_s18 = sphi %s514_s18, %s576_s18   ;;  %s472_s17 = sphi %s512_s17, %s575_s17   ;;  %s468_s16 = sphi %s510_s16, %s574_s16   ;;  %s464_s15 = sphi %s508_s15, %s573_s15  }
   0x4   : > { %p24_p0 = scmp.ge.s32.totalorder %s23_s20, 2  ;;  %p391_p1 = scmp.ge.s32.totalorder %s480_s19, 1 }
   0x5   : > { %p196_p2 = scmp.lt.s32.totalorder %s480_s19, 5 }
   0x6   : > { %s578_s20 = smov (%p24_p0, %s23_s20), 0  ;;  %s580_s21 = smov (!%p24_p0, %s26_s21), %s476_s18 }
   0x7   : > { %p197_p3 = pnand %p391_p1, %p196_p2  ;;  %p28_p4 = scmp.ge.s32.totalorder %s580_s21, 2 }
   0x8   : > { %p236_p5 = scmp.lt.s32.totalorder (!%p197_p3), %s468_s16, 1  ;;  %p238_p6 = scmp.lt.s32.totalorder (!%p197_p3), %s464_s15, 1 }
   0x9   : > { %s582_s21 = smov (%p28_p4, %s580_s21), 0  ;;  %200 = sbr.rel (%p197_p3) target bundleno = 154 (0x9a), region = 36 }
   0xe   : > { %v261_v0 = vld [vmem:[%s570_s2] sm:$0xf]  ;;  %v482_v1 = vmov 0   ;;  %s584_s16 = smov (!%p236_p5, %s468_s16), 1  ;;  %s586_s15 = smov (!%p238_p6, %s464_s15), 1 }
   0xf   : > { %441 = vset.pattern.permute.xlu0 %v482_v1  ;;  %v268_v2 = vld [vmem:[%s571_s3] sm:$0xf]  ;;  %s392_s26 = sshll.u32 %s584_s16, 1 }
  0x10   : > { %264 = vperm.xlu0 %441, %v261_v0   ;;  %s241_s27 = sadd.s32 %s392_s26, %s586_s15 }
  0x11   : > { %s393_s28 = sshll.u32 %s241_s27, 2 }
  0x12   : > { %s243_s5 = scalar_lea.vmem %s568_s0, %s393_s28  ;;  %s251_s8 = scalar_lea.vmem %s569_s1, %s393_s28 }
  0x13   : > { %v260_v4 = vld [vmem:[%s243_s5] sm:$0xf]  ;;  %s259_s11 = scalar_lea.vmem %s572_s4, %s393_s28 }
  0x14   : > { %v280_v12 = vld [vmem:[%s251_s8] sm:$0xf] }
  0x18   : > { %271 = vperm.xlu0 %441, %v268_v2  }
  0x82   : > { %v265_v3 = vpop.permute.xlu0 %264 }
  0x83   : > { %v267_v5 = vmul.f32 %v265_v3, %v260_v4 }
  0x8a   : > { %v272_v6 = vpop.permute.xlu0 %271 }
  0x8b   : > { %v274_v7 = vadd.f32 %v272_v6, %v267_v5 }
  0x8d   : > { %v275_v8 = vadd.f32 3.0, %v274_v7 }
  0x8f   : > { %v276_v9 = vmax.f32 %v275_v8, 0.0 }
  0x91   : > { %v277_v10 = vmin.f32 %v276_v9, 6.0 }
  0x93   : > { %v278_v11 = vmul.f32 %v277_v10, %v274_v7 }
  0x95   : > { %v279_v13 = vmul.f32 0.16666667, %v278_v11 }
  0x97   : > { %v281_v14 = vadd.f32 %v280_v12, %v279_v13 }
  0x99   : > { %282 = vst [vmem:[%s259_s11] sm:$0xf] %v281_v14 }
  0x9a PF: > { %s14_s19 = sadd.s32 1, %s480_s19   ;;  %s573_s15 = smov %s472_s17 }
  0x9b   : > { %p11_p7 = scmp.ge.s32.totalorder %s14_s19, 6   ;;  %s574_s16 = smov %s476_s18 }
  0x9c   : > { %s575_s17 = smov %s578_s20  ;;  %s576_s18 = smov %s582_s21 }
  0x9d   :  { %13 = sbr.rel (!%p11_p7) target bundleno = 3 (0x3), region = 69 }

// kernel: bottleneck_forward.3
= control target key start
LH: loop header
LB: loop body
LE: loop exit
PB: predicated region body
PF: predicated region fallthrough
CT: control target
= control target key end

     0   :  { %s573_s15 = smov 0   ;;  %s575_s16 = smov 0   ;;  %s646_s0 = inlined_call_operand.vmem [shape: f32[2,4,256], index: 0, kind: input, shape index: {}]   ;;  %s647_s1 = inlined_call_operand.vmem [shape: f32[4,4], index: 1, kind: input, shape index: {}]   ;;  %s648_s2 = inlined_call_operand.vmem [shape: f32[2,4,256], index: 2, kind: output, shape index: {0}]   ;;  %s649_s3 = inlined_call_operand.vmem [shape: f32[2,4,1], index: 3, kind: output, shape index: {1}]   ;;  %s650_s4 = inlined_call_operand.vmem [shape: f32[2,4,1], index: 4, kind: output, shape index: {2}]  }
   0x1   :  { %s577_s17 = smov 0   ;;  %s579_s18 = smov 0  }
   0x2   :  { %s581_s19 = smov 0  }
   0x3 LB: > { %s24_s20 = sadd.s32 1, %s537_s17  ;;  %s27_s21 = sadd.s32 1, %s541_s18  ;;  %s545_s19 = sphi %s581_s19, %s15_s19   ;;  %s541_s18 = sphi %s579_s18, %s654_s18   ;;  %s537_s17 = sphi %s577_s17, %s653_s17   ;;  %s533_s16 = sphi %s575_s16, %s652_s16   ;;  %s529_s15 = sphi %s573_s15, %s651_s15  }
   0x4   : > { %p25_p0 = scmp.ge.s32.totalorder %s24_s20, 2  ;;  %p454_p1 = scmp.ge.s32.totalorder %s545_s19, 1 }
   0x5   : > { %p186_p2 = scmp.lt.s32.totalorder %s545_s19, 5 }
   0x6   : > { %s656_s20 = smov (%p25_p0, %s24_s20), 0  ;;  %s658_s21 = smov (!%p25_p0, %s27_s21), %s541_s18 }
   0x7   : > { %p187_p3 = pnand %p454_p1, %p186_p2  ;;  %p29_p4 = scmp.ge.s32.totalorder %s658_s21, 2 }
   0x8   : > { %p226_p5 = scmp.lt.s32.totalorder (!%p187_p3), %s533_s16, 1  ;;  %p228_p6 = scmp.lt.s32.totalorder (!%p187_p3), %s529_s15, 1 }
   0x9   : > { %s660_s21 = smov (%p29_p4, %s658_s21), 0  ;;  %190 = sbr.rel (%p187_p3) target bundleno = 280 (0x118), region = 28 }
   0xa   : > { %p463_p7 = scmp.ne.s32.totalorder (!%p187_p3), %s529_s15, 0 }
   0xe   : > { %s662_s16 = smov (!%p226_p5, %s533_s16), 1  ;;  %vm256_vm0 = vcmask 1043456   ;;  %v251_v0 = vld [vmem:[%s647_s1] sm:$0xf]  ;;  %vm252_vm1 = vcmask 31744  }
   0xf   : > { %s229_s22 = scalar_select %p228_p6, %s529_s15, 1 }
  0x10   : > { %s455_s23 = sshll.u32 %s662_s16, 1  ;;  %s459_s24 = sshll.u32 %s662_s16, 2 }
  0x11   : > { %s231_s25 = sadd.s32 %s455_s23, %s229_s22  ;;  %s245_s28 = scalar_lea.vmem %s649_s3, %s459_s24 }
  0x12   : > { %s456_s29 = sshll.u32 %s231_s25, 2  ;;  %s613_s6 = scalar_lea.vmem %s650_s4, %s459_s24 }
  0x13   : > { %s233_s9 = scalar_lea.vmem %s646_s0, %s456_s29  ;;  %s241_s14 = scalar_lea.vmem %s648_s2, %s456_s29 }
  0x14   : > { %v250_v1 = vld [vmem:[%s233_s9] sm:$0xf] }
  0x15   : > { %461 = vmatpush.msk.msra.mxu0 %vm256_vm0, %v250_v1 }
  0x16   : > { %462 = vmatmul.msk.f32.vlgmr.msra.gmra.mxu0 %vm252_vm1, %v251_v0 }
  0x90   : > { %284 = sbr.rel (%p463_p7) target bundleno = 152 (0x98), region = 32 }
  0x93   : > { %v277_v2 = vpop.f32.mrf.mxu0 }
  0x94   : > { %280 = vst [vmem:[%s241_s14] sm:$0xf] %v277_v2 }
  0x95   : > { %vm285_vm2 = vcmask 3072   ;;  %v547_v3 = vmov 0.0  }
  0x96   : > { %286 = vst.msk [vmem:[%s245_s28] sm:$0xf] %vm285_vm2, %v547_v3 }
  0x97   : > { %287 = vst.msk [vmem:[%s613_s6] sm:$0xf] %vm285_vm2, %v547_v3 }
  0x98 PF: > { %v289_v4 = vsel %vm256_vm0, %v277_v2, 0.0  ;;  %v296_v5 = vmul.f32 %v277_v2, %v277_v2  ;;  %vm293_vm3 = vcmask 3072  }
  0x99   : > { %290 = vadd.xlane.f32.xlu0 %v289_v4 }
  0x9a   : > { %v297_v6 = vsel %vm256_vm0, %v296_v5, 0.0 }
  0x9d   : > { %v288_v7 = vld [vmem:[%s245_s28] sm:$0xf] }
  0x9e   : > { %v295_v10 = vld [vmem:[%s613_s6] sm:$0xf] }
  0xa1   : > { %298 = vadd.xlane.f32.xlu0 %v297_v6 }
 0x10c   : > { %v291_v8 = vpop.xlane.xlu0 %290 }
 0x10d   : > { %v292_v9 = vadd.f32 %v291_v8, %v288_v7 }
 0x10f   : > { %294 = vst.msk [vmem:[%s245_s28] sm:$0xf] %vm293_vm3, %v292_v9 }
 0x114   : > { %v299_v11 = vpop.xlane.xlu0 %298 }
 0x115   : > { %v300_v12 = vadd.f32 %v299_v11, %v295_v10 }
 0x117   : > { %301 = vst.msk [vmem:[%s613_s6] sm:$0xf] %vm293_vm3, %v300_v12 }
 0x118 PF: > { %s15_s19 = sadd.s32 1, %s545_s19   ;;  %s651_s15 = smov %s537_s17 }
 0x119   : > { %p12_p8 = scmp.ge.s32.totalorder %s15_s19, 6   ;;  %s652_s16 = smov %s541_s18 }
 0x11a   : > { %s653_s17 = smov %s656_s20  ;;  %s654_s18 = smov %s660_s21 }
 0x11b   :  { %14 = sbr.rel (!%p12_p8) target bundleno = 3 (0x3), region = 86 }

// kernel: bottleneck_forward.4
= control target key start
LH: loop header
LB: loop body
LE: loop exit
PB: predicated region body
PF: predicated region fallthrough
CT: control target
= control target key end

     0   :  { %s1201_s24 = smov 0   ;;  %s1366_s0 = inlined_call_operand.vmem [shape: f32[2,4,256], index: 0, kind: input, shape index: {}]   ;;  %s1367_s1 = inlined_call_operand.vmem [shape: f32[4,1], index: 1, kind: input, shape index: {}]   ;;  %s1368_s2 = inlined_call_operand.vmem [shape: f32[4,1], index: 2, kind: input, shape index: {}]   ;;  %s1369_s3 = inlined_call_operand.vmem [shape: f32[3,3,4,4], index: 3, kind: input, shape index: {}]   ;;  %s1370_s4 = inlined_call_operand.vmem [shape: s32[1,256], index: 4, kind: input, shape index: {}]   ;;  %s1371_s5 = inlined_call_operand.vmem [shape: f32[2,4,256], index: 5, kind: output, shape index: {0}]   ;;  %s1372_s6 = inlined_call_operand.vmem [shape: f32[2,4,1], index: 6, kind: output, shape index: {1}]   ;;  %s1373_s7 = inlined_call_operand.vmem [shape: f32[2,4,1], index: 7, kind: output, shape index: {2}]  }
   0x1 LB: > { %s1065_s25 = sadd.s32 4294967295, %s1149_s24   ;;  %p1069_p0 = scmp.ge.s32.totalorder %s1149_s24, 1  ;;  %s1149_s24 = sphi %s1201_s24, %s18_s24  }
   0x2   : > { %p242_p1 = scmp.lt.s32.totalorder %s1149_s24, 3 }
   0x4   : > { %p243_p2 = pnand %p1069_p0, %p242_p1 }
   0x5   : > { %p282_p3 = scmp.lt.s32.totalorder (!%p243_p2), %s1065_s25, 1  ;;  %s1153_s11 = smov (!%p243_p2), 17  }
   0x6   : > { %246 = sbr.rel (%p243_p2) target bundleno = 590 (0x24e), region = 40  ;;  %s1154_s12 = smov (!%p243_p2), 16  }
   0x7   : > { %s1155_s13 = smov (!%p243_p2), 15   ;;  %s1156_s14 = smov (!%p243_p2), 1  }
   0x8   : > { %s1157_s15 = smov (!%p243_p2), 127   ;;  %s1158_s16 = smov (!%p243_p2), 113  }
   0x9   : > { %s1159_s17 = smov (!%p243_p2), 112   ;;  %s1160_s18 = smov (!%p243_p2), 111  }
   0xb   : > { %v301_v0 = vld [vmem:[%s1367_s1] sm:$0xf]  ;;  %v1151_v1 = vmov 0   ;;  %s1383_s25 = smov (!%p282_p3, %s1065_s25), 1  ;;  %v1152_v3 = vmov 839922192  }
   0xc   : > { %1142 = vset.pattern.permute.xlu0 %v1151_v1  ;;  %v312_v2 = vld [vmem:[%s1368_s2] sm:$0xf]  ;;  %v307_v4 = vunpack.c.l.s4 %v1152_v3  ;;  %s1122_s30 = sshll.u32 %s1383_s25, 3  ;;  %vm361_vm0 = vcmask 130048   ;;  %vm371_vm1 = vcmask 1043456   ;;  %vm367_vm4 = vcmask 31744  }
   0xd   : > { %304 = vperm.xlu0 %1142, %v301_v0   ;;  %s286_s10 = scalar_lea.vmem %s1366_s0, %s1122_s30  ;;  %v328_v36 = vld [vmem:[%s1370_s4] sm:$0x3]  ;;  %v1076_v40 = vld [vmem:[%s1369_s3 + $0x4] sm:$0xf]  ;;  %vm549_vm6 = vcmask 7168   ;;  %vm337_vm7 = vcmask 138240   ;;  %s291_s21 = scalar_lea.vmem %s1371_s5, %s1122_s30 }
   0xe   : > { %v308_v6 = vunpack.c.0.s8 %v307_v4  ;;  %v300_v8 = vld [vmem:[%s286_s10] sm:$0xff]  ;;  %v342_v37 = vadd.s32 4294967295, %v328_v36  ;;  %v478_v45 = vadd.s32 1, %v328_v36  ;;  %v1090_v62 = vld [vmem:[%s1369_s3 + $0xc] sm:$0xf]  ;;  %vm473_vm13 = vcmask 121856  }
   0xf   : > { %v353_v54 = vld [vmem:[%s1369_s3] sm:$0xf]  ;;  %s1074_s22 = sshll.u32 %s1383_s25, 2 }
  0x10   : > { %vm343_vm2 = vcmp.ge.s32.totalorder %v342_v37, 0  ;;  %vm344_vm3 = vcmp.lt.s32.totalorder %v342_v37, 16  ;;  %vm479_vm9 = vcmp.ge.s32.totalorder %v478_v45, 0  ;;  %vm480_vm10 = vcmp.lt.s32.totalorder %v478_v45, 16  ;;  %s295_s26 = scalar_lea.vmem %s1372_s6, %s1074_s22  ;;  %s299_s29 = scalar_lea.vmem %s1373_s7, %s1074_s22 }
  0x11   : > { %vm345_vm5 = vmand %vm343_vm2, %vm344_vm3  ;;  %vm867_vm2 = vcmask 908288   ;;  %vm737_vm3 = vcmask 924672  }
  0x12   : > { %v346_v41 = vsel %vm345_vm5, 1, %v1151_v1  ;;  %vm481_vm11 = vmand %vm479_vm9, %vm480_vm10  ;;  %vm804_vm5 = vcmask 916480  }
  0x13   : > { %v347_v44 = vperm.slane %v346_v41, 0  ;;  %v348_v53 = vperm.slane %v346_v41, 1  ;;  %v482_v57 = vsel %vm481_vm11, 1, %v1151_v1 }
  0x14   : > { %v484_v60 = vperm.slane %v482_v57, 1  ;;  %v483_v61 = vperm.slane %v482_v57, 0 }
  0x15   : > { %315 = vperm.xlu0 %1142, %v312_v2   ;;  %vm1239_vm8 = vcmp.eq.s32.totalorder %v347_v44, 1  ;;  %vm1255_vm12 = vcmp.eq.s32.totalorder %v348_v53, 1 }
  0x16   : > { %vm1269_vm14 = vcmp.eq.s32.totalorder %v484_v60, 1  ;;  %vm1273_vm15 = vcmp.eq.s32.totalorder %v483_v61, 1 }
  0x7f   : > { %v305_v5 = vpop.permute.xlu0 %304 }
  0x80   : > { %v309_v7 = vperm.slane %v305_v5, %v308_v6 }
  0x82   : > { %v311_v10 = vmul.f32 %v309_v7, %v300_v8  ;;  %v1085_v7 = vld [vmem:[%s1369_s3 + $0x8] sm:$0xf] }
  0x87   : > { %v316_v9 = vpop.permute.xlu0 %315 }
  0x88   : > { %v320_v11 = vperm.slane %v316_v9, %v308_v6 }
  0x8a   : > { %v322_v12 = vadd.f32 %v320_v11, %v311_v10 }
  0x8c   : > { %v323_v13 = vadd.f32 3.0, %v322_v12 }
  0x8e   : > { %v324_v14 = vmax.f32 %v323_v13, 0.0  ;;  %v1095_v13 = vld [vmem:[%s1369_s3 + $0x10] sm:$0xf] }
  0x90   : > { %v325_v15 = vmin.f32 %v324_v14, 6.0 }
  0x92   : > { %v326_v16 = vmul.f32 %v325_v15, %v322_v12 }
  0x94   : > { %v327_v17 = vmul.f32 0.16666667, %v326_v16  ;;  %v1100_v16 = vld [vmem:[%s1369_s3 + $0x14] sm:$0xf] }
  0x96   : > { %330 = vst [vmem:[#allocation1] ss:$2 sm:$0xff] %v327_v17 }
  0x9d   : > { %v331_v18 = vld.sshfl [vmem:[#allocation1] sm:$0xff pattern:$0x75316420]  ;;  %v332_v19 = vld.sshfl [vmem:[#allocation1 + $0x8] sm:$0xff pattern:$0x75316420] }
  0x9e   : > { %333 = vrot.lane.b32.xlu1 %v331_v18, %s1153_s11  ;;  %354 = vst [vmem:[#allocation1] ss:$2 sm:$0xff] %v327_v17 }
  0xa5   : > { %v355_v20 = vld.sshfl [vmem:[#allocation1] sm:$0xff pattern:$0x75316420]  ;;  %v356_v21 = vld.sshfl [vmem:[#allocation1 + $0x8] sm:$0xff pattern:$0x75316420] }
  0xa6   : > { %335 = vrot.lane.b32.xlu1 %v332_v19, %s1153_s11  ;;  %357 = vrot.lane.b32.xlu2 %v355_v20, %s1154_s12  ;;  %466 = vst [vmem:[#allocation1] ss:$2 sm:$0xff] %v327_v17 }
  0xad   : > { %v468_v22 = vld.sshfl [vmem:[#allocation1 + $0x8] sm:$0xff pattern:$0x75316420]  ;;  %v467_v23 = vld.sshfl [vmem:[#allocation1] sm:$0xff pattern:$0x75316420] }
  0xae   : > { %359 = vrot.lane.b32.xlu2 %v356_v21, %s1154_s12  ;;  %471 = vrot.lane.b32.xlu1 %v468_v22, %s1155_s13  ;;  %542 = vst [vmem:[#allocation1] ss:$2 sm:$0xff] %v327_v17 }
  0xaf   : > { %469 = vrot.lane.b32.xlu0 %v467_v23, %s1155_s13 }
  0xb5   : > { %v544_v24 = vld.sshfl [vmem:[#allocation1 + $0x8] sm:$0xff pattern:$0x75316420]  ;;  %v543_v25 = vld.sshfl [vmem:[#allocation1] sm:$0xff pattern:$0x75316420] }
  0xb6   : > { %545 = vrot.lane.b32.xlu2 %v543_v25, %s1156_s14  ;;  %611 = vst [vmem:[#allocation1] ss:$2 sm:$0xff] %v327_v17 }
  0xb7   : > { %547 = vrot.lane.b32.xlu0 %v544_v24, %s1156_s14 }
  0xbd   : > { %v1224_v26 = vld.sshfl [vmem:[#allocation1] sm:$0xff pattern:$0x75316420]  ;;  %v1226_v27 = vld.sshfl [vmem:[#allocation1 + $0x8] sm:$0xff pattern:$0x75316420] }
  0xbe   : > { %663 = vst [vmem:[#allocation1] ss:$2 sm:$0xff] %v327_v17 }
  0xc5   : > { %v665_v28 = vld.sshfl [vmem:[#allocation1 + $0x8] sm:$0xff pattern:$0x75316420]  ;;  %v664_v29 = vld.sshfl [vmem:[#allocation1] sm:$0xff pattern:$0x75316420] }
  0xc6   : > { %668 = vrot.lane.b32.xlu2 %v665_v28, %s1157_s15  ;;  %666 = vrot.lane.b32.xlu1 %v664_v29, %s1157_s15  ;;  %730 = vst [vmem:[#allocation1] ss:$2 sm:$0xff] %v327_v17 }
  0xcd   : > { %v732_v30 = vld.sshfl [vmem:[#allocation1 + $0x8] sm:$0xff pattern:$0x75316420]  ;;  %v731_v31 = vld.sshfl [vmem:[#allocation1] sm:$0xff pattern:$0x75316420] }
  0xce   : > { %735 = vrot.lane.b32.xlu1 %v732_v30, %s1158_s16  ;;  %733 = vrot.lane.b32.xlu0 %v731_v31, %s1158_s16  ;;  %797 = vst [vmem:[#allocation1] ss:$2 sm:$0xff] %v327_v17  ;;  %v1110_v31 = vld [vmem:[%s1369_s3 + $0x1c] sm:$0xf] }
  0xd5   : > { %v799_v32 = vld.sshfl [vmem:[#allocation1 + $0x8] sm:$0xff pattern:$0x75316420]  ;;  %v798_v33 = vld.sshfl [vmem:[#allocation1] sm:$0xff pattern:$0x75316420] }
  0xd6   : > { %802 = vrot.lane.b32.xlu0 %v799_v32, %s1159_s17  ;;  %800 = vrot.lane.b32.xlu2 %v798_v33, %s1159_s17  ;;  %860 = vst [vmem:[#allocation1] ss:$2 sm:$0xff] %v327_v17 }
  0xdd   : > { %v862_v34 = vld.sshfl [vmem:[#allocation1 + $0x8] sm:$0xff pattern:$0x75316420]  ;;  %v861_v35 = vld.sshfl [vmem:[#allocation1] sm:$0xff pattern:$0x75316420] }
  0xde   : > { %865 = vrot.lane.b32.xlu2 %v862_v34, %s1160_s18  ;;  %863 = vrot.lane.b32.xlu1 %v861_v35, %s1160_s18  ;;  %v1115_v34 = vld [vmem:[%s1369_s3 + $0x20] sm:$0xf] }
 0x100   : > { %v358_v38 = vpop.permute.xlu2 %357 }
 0x101   : > { %v364_v39 = vsel %vm361_vm0, 0.0, %v358_v38 }
 0x102   : > { %1077 = vmatpush.msk.msra.mxu0 %vm371_vm1, %v364_v39 }
 0x103   : > { %1078 = vmatmul.msk.f32.vlgmr.msra.gmra.mxu0 %vm367_vm4, %v1076_v40 }
 0x108   : > { %v360_v42 = vpop.permute.xlu2 %359 }
 0x109   : > { %v362_v43 = vsel %vm361_vm0, %v358_v38, %v360_v42  ;;  %vm670_vm0 = vcmask 1039360  }
 0x10a   : > { %1079 = vmatpush.msk.msra.mxu1 %vm371_vm1, %v362_v43 }
 0x10b   : > { %1080 = vmatmul.msk.f32.vlgmr.msra.gmra.mxu1 %vm367_vm4, %v1076_v40 }
 0x110   : > { %v334_v47 = vpop.permute.xlu1 %333  ;;  %v546_v48 = vpop.permute.xlu2 %545 }
 0x111   : > { %v553_v49 = vsel %vm549_vm6, 0.0, %v546_v48  ;;  %v341_v50 = vsel %vm337_vm7, 0.0, %v334_v47 }
 0x112   : > { %v351_v51 = vsel %vm1239_vm8, %v341_v50, 0.0  ;;  %v554_v52 = vsel %vm1239_vm8, %v553_v49, 0.0 }
 0x113   : > { %1081 = vmatpush.msk.msra.mxu2 %vm371_vm1, %v351_v51 }
 0x114   : > { %1082 = vmatmul.msk.f32.vlgmr.msra.gmra.mxu2 %vm367_vm4, %v353_v54 }
 0x115   : > { %1091 = vmatpush.msk.msrb.mxu2 %vm371_vm1, %v554_v52 }
 0x118   : > { %v336_v56 = vpop.permute.xlu1 %335 }
 0x119   : > { %v338_v58 = vsel %vm337_vm7, %v334_v47, %v336_v56 }
 0x11a   : > { %v352_v59 = vsel %vm1255_vm12, %v338_v58, 0.0 }
 0x11b   : > { %1083 = vmatpush.msk.msra.mxu3 %vm371_vm1, %v352_v59 }
 0x11c   : > { %1084 = vmatmul.msk.f32.vlgmr.msra.gmra.mxu3 %vm367_vm4, %v353_v54  ;;  %1092 = vmatmul.msk.f32.vlgmr.msrb.gmra.mxu2 %vm367_vm4, %v1090_v62 }
 0x120   : > { %v472_v63 = vpop.permute.xlu1 %471  ;;  %v669_v8 = vpop.permute.xlu2 %668 }
 0x121   : > { %v470_v2 = vpop.permute.xlu0 %469  ;;  %v674_v9 = vsel %vm670_vm0, %v669_v8, 0.0 }
 0x122   : > { %v474_v3 = vsel %vm473_vm13, %v470_v2, %v472_v63  ;;  %v477_v4 = vsel %vm473_vm13, 0.0, %v470_v2  ;;  %v676_v14 = vsel %vm1269_vm14, %v674_v9, 0.0 }
 0x123   : > { %v487_v5 = vsel %vm1273_vm15, %v477_v4, 0.0  ;;  %v488_v6 = vsel %vm1269_vm14, %v474_v3, 0.0 }
 0x124   : > { %1086 = vmatpush.msk.msrb.mxu0 %vm371_vm1, %v487_v5  ;;  %1088 = vmatpush.msk.msrb.mxu1 %vm371_vm1, %v488_v6 }
 0x125   : > { %1087 = vmatmul.msk.f32.vlgmr.msrb.gmra.mxu0 %vm367_vm4, %v1085_v7  ;;  %1089 = vmatmul.msk.f32.vlgmr.msrb.gmra.mxu1 %vm367_vm4, %v1085_v7 }
 0x126   : > { %1096 = vmatpush.msk.msra.mxu0 %vm371_vm1, %v1224_v26  ;;  %1098 = vmatpush.msk.msra.mxu1 %vm371_vm1, %v1226_v27  ;;  %v1105_v26 = vld [vmem:[%s1369_s3 + $0x18] sm:$0xf] }
 0x129   : > { %v548_v10 = vpop.permute.xlu0 %547 }
 0x12a   : > { %v550_v11 = vsel %vm549_vm6, %v546_v48, %v548_v10 }
 0x12b   : > { %v555_v12 = vsel %vm1255_vm12, %v550_v11, 0.0 }
 0x12c   : > { %1093 = vmatpush.msk.msrb.mxu3 %vm371_vm1, %v555_v12 }
 0x12d   : > { %1094 = vmatmul.msk.f32.vlgmr.msrb.gmra.mxu3 %vm367_vm4, %v1090_v62  ;;  %1097 = vmatmul.msk.f32.vlgmr.msra.gmra.mxu0 %vm367_vm4, %v1095_v13 }
 0x12e   : > { %1103 = vmatpush.msk.msra.mxu3 %vm371_vm1, %v676_v14  ;;  %1099 = vmatmul.msk.f32.vlgmr.msra.gmra.mxu1 %vm367_vm4, %v1095_v13 }
 0x130   : > { %v801_v15 = vpop.permute.xlu2 %800 }
 0x135   : > { %1104 = vmatmul.msk.f32.vlgmr.msra.gmra.mxu3 %vm367_vm4, %v1100_v16 }
 0x138   : > { %v667_v17 = vpop.permute.xlu1 %666  ;;  %v866_v20 = vpop.permute.xlu2 %865 }
 0x139   : > { %v671_v18 = vsel %vm670_vm0, %v667_v17, %v669_v8  ;;  %v871_v21 = vsel %vm867_vm2, %v866_v20, 0.0 }
 0x13a   : > { %v675_v19 = vsel %vm1273_vm15, %v671_v18, 0.0  ;;  %v873_v29 = vsel %vm1269_vm14, %v871_v21, 0.0 }
 0x13b   : > { %1101 = vmatpush.msk.msra.mxu2 %vm371_vm1, %v675_v19 }
 0x13c   : > { %1102 = vmatmul.msk.f32.vlgmr.msra.gmra.mxu2 %vm367_vm4, %v1100_v16 }
 0x140   : > { %v736_v22 = vpop.permute.xlu1 %735  ;;  %v734_v23 = vpop.permute.xlu0 %733 }
 0x141   : > { %v741_v24 = vsel %vm737_vm3, %v736_v22, 0.0  ;;  %v738_v25 = vsel %vm737_vm3, %v734_v23, %v736_v22 }
 0x142   : > { %v743_v27 = vsel %vm1255_vm12, %v741_v24, 0.0  ;;  %v742_v28 = vsel %vm1239_vm8, %v738_v25, 0.0 }
 0x143   : > { %1106 = vmatpush.msk.msrb.mxu0 %vm371_vm1, %v742_v28  ;;  %1108 = vmatpush.msk.msrb.mxu1 %vm371_vm1, %v743_v27 }
 0x144   : > { %1107 = vmatmul.msk.f32.vlgmr.msrb.gmra.mxu0 %vm367_vm4, %v1105_v26  ;;  %1109 = vmatmul.msk.f32.vlgmr.msrb.gmra.mxu1 %vm367_vm4, %v1105_v26 }
 0x145   : > { %1118 = vmatpush.msk.msra.mxu1 %vm371_vm1, %v873_v29 }
 0x148   : > { %v803_v30 = vpop.permute.xlu0 %802 }
 0x149   : > { %v805_v32 = vsel %vm804_vm5, %v801_v15, %v803_v30  ;;  %v807_v33 = vsel %vm804_vm5, %v803_v30, 0.0 }
 0x14a   : > { %1111 = vmatpush.msk.msrb.mxu2 %vm371_vm1, %v805_v32  ;;  %1113 = vmatpush.msk.msrb.mxu3 %vm371_vm1, %v807_v33 }
 0x14b   : > { %1112 = vmatmul.msk.f32.vlgmr.msrb.gmra.mxu2 %vm367_vm4, %v1110_v31  ;;  %1114 = vmatmul.msk.f32.vlgmr.msrb.gmra.mxu3 %vm367_vm4, %v1110_v31 }
 0x14c   : > { %1119 = vmatmul.msk.f32.vlgmr.msra.gmra.mxu1 %vm367_vm4, %v1115_v34 }
 0x150   : > { %v864_v35 = vpop.permute.xlu1 %863 }
 0x151   : > { %v868_v36 = vsel %vm867_vm2, %v864_v35, %v866_v20 }
 0x152   : > { %v872_v37 = vsel %vm1273_vm15, %v868_v36, 0.0 }
 0x153   : > { %1116 = vmatpush.msk.msra.mxu0 %vm371_vm1, %v872_v37 }
 0x154   : > { %1117 = vmatmul.msk.f32.vlgmr.msra.gmra.mxu0 %vm367_vm4, %v1115_v34  ;;  %vm938_vm4 = vcmask 3072  }
 0x180   : > { %v394_v39 = vpop.f32.mrf.mxu0 }
 0x188   : > { %v414_v38 = vpop.f32.mrf.mxu1 }
 0x197   : > { %v443_v42 = vpop.f32.mrf.mxu2 }
 0x198   : > { %v444_v44 = vadd.f32 %v443_v42, %v394_v39 }
 0x19f   : > { %v463_v40 = vpop.f32.mrf.mxu3  ;;  %v584_v48 = vpop.f32.mrf.mxu2 }
 0x1a0   : > { %v464_v45 = vadd.f32 %v463_v40, %v414_v38 }
 0x1a2   : > { %v537_v41 = vpop.f32.mrf.mxu1  ;;  %v517_v43 = vpop.f32.mrf.mxu0 }
 0x1a3   : > { %v540_v49 = vadd.f32 %v517_v43, %v444_v44  ;;  %v541_v50 = vadd.f32 %v537_v41, %v464_v45 }
 0x1a5   : > { %v607_v52 = vadd.f32 %v584_v48, %v540_v49 }
 0x1aa   : > { %v638_v51 = vpop.f32.mrf.mxu0 }
 0x1ab   : > { %v658_v47 = vpop.f32.mrf.mxu1  ;;  %v661_v57 = vadd.f32 %v638_v51, %v607_v52 }
 0x1b0   : > { %v604_v46 = vpop.f32.mrf.mxu3 }
 0x1b1   : > { %v608_v53 = vadd.f32 %v604_v46, %v541_v50 }
 0x1b3   : > { %v662_v58 = vadd.f32 %v658_v47, %v608_v53 }
 0x1b8   : > { %v725_v56 = vpop.f32.mrf.mxu3 }
 0x1b9   : > { %v729_v61 = vadd.f32 %v725_v56, %v662_v58 }
 0x1bf   : > { %v705_v55 = vpop.f32.mrf.mxu2 }
 0x1c0   : > { %v728_v59 = vadd.f32 %v705_v55, %v661_v57 }
 0x1c1   : > { %v792_v54 = vpop.f32.mrf.mxu1  ;;  %v772_v60 = vpop.f32.mrf.mxu0 }
 0x1c2   : > { %v795_v62 = vadd.f32 %v772_v60, %v728_v59  ;;  %v796_v63 = vadd.f32 %v792_v54, %v729_v61 }
 0x1c9   : > { %v922_v0 = vpop.f32.mrf.mxu1 }
 0x1ce   : > { %v835_v1 = vpop.f32.mrf.mxu2  ;;  %v855_v2 = vpop.f32.mrf.mxu3 }
 0x1cf   : > { %v858_v3 = vadd.f32 %v835_v1, %v795_v62  ;;  %v859_v4 = vadd.f32 %v855_v2, %v796_v63 }
 0x1d1   : > { %v926_v5 = vadd.f32 %v922_v0, %v859_v4  ;;  %v902_v6 = vpop.f32.mrf.mxu0 }
 0x1d2   : > { %v925_v7 = vadd.f32 %v902_v6, %v858_v3 }
 0x1d3   : > { %v929_v8 = vrot.slane %v926_v5, 4  ;;  %v934_v9 = vsel %vm371_vm1, %v926_v5, 0.0  ;;  %v941_v10 = vmul.f32 %v926_v5, %v926_v5 }
 0x1d4   : > { %v933_v11 = vsel %vm371_vm1, %v925_v7, 0.0  ;;  %v940_v12 = vmul.f32 %v925_v7, %v925_v7 }
 0x1d5   : > { %v930_v13 = vsel %vm371_vm1, %v925_v7, %v929_v8  ;;  %v935_v14 = vadd.f32 %v934_v9, %v933_v11  ;;  %v943_v15 = vsel %vm371_vm1, %v941_v10, 0.0 }
 0x1d6   : > { %932 = vst [vmem:[%s291_s21] sm:$0xff] %v930_v13  ;;  %v942_v16 = vsel %vm371_vm1, %v940_v12, 0.0 }
 0x1d7   : > { %936 = vadd.xlane.f32.xlu0 %v935_v14  ;;  %v944_v17 = vadd.f32 %v943_v15, %v942_v16 }
 0x1d9   : > { %945 = vadd.xlane.f32.xlu1 %v944_v17 }
 0x24a   : > { %v937_v18 = vpop.xlane.xlu0 %936 }
 0x24b   : > { %939 = vst.msk [vmem:[%s295_s26] sm:$0xf] %vm938_vm4, %v937_v18 }
 0x24c   : > { %v946_v19 = vpop.xlane.xlu1 %945 }
 0x24d   : > { %947 = vst.msk [vmem:[%s299_s29] sm:$0xf] %vm938_vm4, %v946_v19 }
 0x24e PF: > { %s18_s24 = sadd.s32 1, %s1149_s24  }
 0x24f   : > { %p15_p4 = scmp.ge.s32.totalorder %s18_s24, 4  }
 0x251   :  { %17 = sbr.rel (!%p15_p4) target bundleno = 1 (0x1), region = 102 }

</bundles_post_ra>
